<compile_context>
chip_gen: v7x
topology: tpu7x:2x2x1
jax: 0.10.0
libtpu: 0.0.40
codegen_flags: <defaults>
</compile_context>

<pallas_src>
import functools
import math

import jax
import jax.numpy as jnp
from jax import lax
from jax.experimental import pallas as pl
from jax.experimental.pallas import tpu as pltpu

NEG_INF = -1e30


def _vmem_limit_bytes():
    """Generation-aware scoped-VMEM budget (v5e/v6e: 128 MiB phys, v7x: 64 MiB)."""
    try:
        cap = int(pltpu.get_tpu_info().vmem_capacity_bytes)
        if cap > 0:
            return int(min(cap * 3 // 4, 96 * 1024 * 1024))
    except Exception:
        pass
    return 48 * 1024 * 1024


def _layernorm_f32(x, w, b, eps):
    # torch LayerNorm: biased variance, fp32 math.
    mean = jnp.mean(x, axis=-1, keepdims=True)
    var = jnp.mean((x - mean) ** 2, axis=-1, keepdims=True)
    return (x - mean) * lax.rsqrt(var + eps) * w + b


# --------------------------------------------------------------------------
# Kernel A: norm_1 + fused QKV projection, tiled over (batch, seq-tile, head)
# --------------------------------------------------------------------------
def _ln_qkv_kernel(x_ref, ln1w_ref, ln1b_ref, w_ref, b_ref,
                   q_ref, k_ref, v_ref, a_scr, *, eps):
    h = pl.program_id(2)

    # norm_1 is computed once per (batch, seq-tile) group and kept in VMEM
    # scratch across the innermost ("arbitrary") head axis.
    @pl.when(h == 0)
    def _():
        x = x_ref[0].astype(jnp.float32)
        a = _layernorm_f32(x, ln1w_ref[...].astype(jnp.float32),
                           ln1b_ref[...].astype(jnp.float32), eps)
        a_scr[...] = a.astype(a_scr.dtype)

    # (TS, D) @ (D, 3*hd) -> (TS, 3*hd), fp32 accumulation on the MXU.
    qkv = jnp.dot(a_scr[...], w_ref[0],
                  preferred_element_type=jnp.float32) + b_ref[0]
    hd = q_ref.shape[-1]
    q_ref[0, 0] = qkv[:, 0 * hd:1 * hd].astype(q_ref.dtype)
    k_ref[0, 0] = qkv[:, 1 * hd:2 * hd].astype(k_ref.dtype)
    v_ref[0, 0] = qkv[:, 2 * hd:3 * hd].astype(v_ref.dtype)


# --------------------------------------------------------------------------
# Kernel B: causal flash attention, grid (B, H, n_q), KV loop inside.
#   q is pre-scaled (1/sqrt(hd) folded into Wq/bq on the host).
#   k/v are a VMEM-resident (S, hd) slab fetched once per (b, h).
# --------------------------------------------------------------------------
def _flash_attn_kernel(q_ref, k_ref, v_ref, ctx_ref, *, block_kv):
    qi = pl.program_id(2)
    q = q_ref[0, 0]                                  # (TQ, hd)
    block_q, hd = q.shape

    def kv_block(ki):
        start = pl.multiple_of(ki * block_kv, block_kv)
        k = k_ref[0, 0, pl.ds(start, block_kv), :]
        v = v_ref[0, 0, pl.ds(start, block_kv), :]
        return k, v

    def online_step(s, v, carry):
        m_prev, l_prev, acc_prev = carry
        m_new = jnp.maximum(m_prev, jnp.max(s, axis=-1, keepdims=True))
        alpha = jnp.exp(m_prev - m_new)
        p = jnp.exp(s - m_new)
        l_new = alpha * l_prev + jnp.sum(p, axis=-1, keepdims=True)
        acc_new = alpha * acc_prev + jnp.dot(
            p.astype(v.dtype), v, preferred_element_type=jnp.float32)
        return m_new, l_new, acc_new

    def unmasked_body(ki, carry):
        k, v = kv_block(ki)
        s = jnp.einsum("qd,kd->qk", q, k, preferred_element_type=jnp.float32)
        return online_step(s, v, carry)

    carry0 = (jnp.full((block_q, 1), NEG_INF, jnp.float32),
              jnp.zeros((block_q, 1), jnp.float32),
              jnp.zeros((block_q, hd), jnp.float32))

    # Fully-unmasked KV blocks: ki in [0, qi). Upper-triangle blocks never run.
    carry = lax.fori_loop(0, qi, unmasked_body, carry0)

    # Diagonal block (ki == qi): element-level causal mask, then finalize.
    k, v = kv_block(qi)
    s = jnp.einsum("qd,kd->qk", q, k, preferred_element_type=jnp.float32)
    row = lax.broadcasted_iota(jnp.int32, s.shape, 0)
    col = lax.broadcasted_iota(jnp.int32, s.shape, 1)
    s = jnp.where(col <= row, s, NEG_INF)
    m_i, l_i, acc = online_step(s, v, carry)

    inv_l = pl.reciprocal(l_i, approx=True)          # EUP vrcp
    ctx_ref[...] = (acc * inv_l).astype(ctx_ref.dtype).reshape(ctx_ref.shape)


# --------------------------------------------------------------------------
# Kernel C: out_proj as (TS, D) @ (D, D) with K=D contraction (accumulator),
#           + residual add + norm_2.  x is donated into x_out.
# --------------------------------------------------------------------------
def _outproj_norm_kernel(ctx_ref, x_ref, w_ref, bout_ref, ln2w_ref, ln2b_ref,
                         x_out_ref, m_out_ref, acc_scr, *, eps):
    ki = pl.program_id(2)

    @pl.when(ki == 0)
    def _():
        acc_scr[...] = jnp.zeros(acc_scr.shape, dtype=acc_scr.dtype)

    # (TS, TK) @ (TK, D), accumulated over the channel contraction in fp32.
    acc_scr[...] += jnp.dot(ctx_ref[0], w_ref[...],
                            preferred_element_type=jnp.float32)

    @pl.when(ki == pl.num_programs(2) - 1)
    def _():
        x = x_ref[0].astype(jnp.float32)
        x_new = x + acc_scr[...] + bout_ref[...]
        x_out_ref[0] = x_new.astype(x_out_ref.dtype)
        m_out_ref[0] = _layernorm_f32(
            x_new, ln2w_ref[...].astype(jnp.float32),
            ln2b_ref[...].astype(jnp.float32), eps).astype(m_out_ref.dtype)


# --------------------------------------------------------------------------
# Wrapper
# --------------------------------------------------------------------------
def fused_norm_attention_norm(x, params, *, n_heads, eps=1e-5,
                              compute_dtype=jnp.bfloat16,
                              block_s=512, block_q=256,
                              block_out=256, block_k=512,
                              donate_x=True):
    """x: (B, S, D). Returns (x_out, m_out, None, None) like the torch module."""
    B, S, D = x.shape
    H = n_heads
    assert D % H == 0
    hd = D // H
    block_s = min(block_s, S)
    block_q = min(block_q, S)
    block_out = min(block_out, S)
    block_k = min(block_k, D)
    assert S % block_s == 0 and S % block_q == 0 and S % block_out == 0
    assert D % block_k == 0
    scale = 1.0 / math.sqrt(hd)
    cdt = compute_dtype
    vmem_limit = _vmem_limit_bytes()

    # ---- host-side parameter repacking (fused by XLA under jit) -----------
    # torch convention: y = x @ W.T + b, W is (out, in).
    wqkv = params["wqkv"]                    # (3D, D)
    bqkv = params["bqkv"]                    # (3D,)
    wout = params["wout"]                    # (D, D)
    bout = params["bout"]                    # (D,)

    wq, wk, wv = jnp.split(wqkv, 3, axis=0)  # (D, D) each

    def _per_head_t(w):                      # (D_out, D_in) -> (H, D_in, hd)
        return jnp.transpose(w.reshape(H, hd, D), (0, 2, 1))

    # Softmax 1/sqrt(hd) scale folded into the Q projection (weights + bias).
    wqkv_h = jnp.concatenate(
        [_per_head_t(wq) * scale, _per_head_t(wk), _per_head_t(wv)],
        axis=-1).astype(cdt)                 # (H, D, 3*hd)

    bq, bk, bv = jnp.split(bqkv, 3)
    bqkv_h = jnp.concatenate(
        [(bq * scale).reshape(H, 1, hd), bk.reshape(H, 1, hd),
         bv.reshape(H, 1, hd)], axis=-1).astype(jnp.float32)   # (H, 1, 3*hd)

    wout_t = jnp.transpose(wout).astype(cdt)                   # (D_in, D_out)
    bout2 = bout.reshape(1, D).astype(jnp.float32)
    ln1w = params["ln1_w"].reshape(1, D).astype(jnp.float32)
    ln1b = params["ln1_b"].reshape(1, D).astype(jnp.float32)
    ln2w = params["ln2_w"].reshape(1, D).astype(jnp.float32)
    ln2b = params["ln2_b"].reshape(1, D).astype(jnp.float32)

    n_s = S // block_s
    n_q = S // block_q

    # ---------------- Kernel A: norm_1 + QKV projection --------------------
    q, k, v = pl.pallas_call(
        functools.partial(_ln_qkv_kernel, eps=eps),
        out_shape=tuple(jax.ShapeDtypeStruct((B, H, S, hd), cdt)
                        for _ in range(3)),
        grid_spec=pltpu.PrefetchScalarGridSpec(
            num_scalar_prefetch=0,
            grid=(B, n_s, H),
            in_specs=[
                pl.BlockSpec((1, block_s, D), lambda b, s, h: (b, s, 0)),
                pl.BlockSpec((1, D), lambda b, s, h: (0, 0)),
                pl.BlockSpec((1, D), lambda b, s, h: (0, 0)),
                pl.BlockSpec((1, D, 3 * hd), lambda b, s, h: (h, 0, 0)),
                pl.BlockSpec((1, 1, 3 * hd), lambda b, s, h: (h, 0, 0)),
            ],
            out_specs=[
                pl.BlockSpec((1, 1, block_s, hd), lambda b, s, h: (b, h, s, 0)),
                pl.BlockSpec((1, 1, block_s, hd), lambda b, s, h: (b, h, s, 0)),
                pl.BlockSpec((1, 1, block_s, hd), lambda b, s, h: (b, h, s, 0)),
            ],
            scratch_shapes=[pltpu.VMEM((block_s, D), cdt)],
        ),
        compiler_params=pltpu.CompilerParams(
            dimension_semantics=("parallel", "parallel", "arbitrary"),
            vmem_limit_bytes=vmem_limit),
    )(x, ln1w, ln1b, wqkv_h, bqkv_h)

    # ---------------- Kernel B: causal flash attention ---------------------
    flat_ctx = (hd % 128 == 0) or (H == 1)
    if flat_ctx:
        # Lane-dense (B, S, D) layout: Kernel C consumes it as a plain matmul.
        ctx_shape = jax.ShapeDtypeStruct((B, S, D), cdt)
        ctx_spec = pl.BlockSpec((1, block_q, hd), lambda b, h, qi: (b, qi, h))
    else:
        # TODO(synk): pack 2+ heads per 128-lane block when hd < 128 instead
        # of falling back to head-major layout + an XLA transpose.
        ctx_shape = jax.ShapeDtypeStruct((B, H, S, hd), cdt)
        ctx_spec = pl.BlockSpec((1, 1, block_q, hd),
                                lambda b, h, qi: (b, h, qi, 0))

    ctx = pl.pallas_call(
        functools.partial(_flash_attn_kernel, block_kv=block_q),
        out_shape=ctx_shape,
        grid_spec=pltpu.PrefetchScalarGridSpec(
            num_scalar_prefetch=0,
            grid=(B, H, n_q),
            in_specs=[
                pl.BlockSpec((1, 1, block_q, hd),
                             lambda b, h, qi: (b, h, qi, 0)),
                # K/V slabs: block index constant across qi -> DMA'd once per
                # (b, h) and kept VMEM-resident for the whole q sweep.
                pl.BlockSpec((1, 1, S, hd), lambda b, h, qi: (b, h, 0, 0)),
                pl.BlockSpec((1, 1, S, hd), lambda b, h, qi: (b, h, 0, 0)),
            ],
            out_specs=ctx_spec,
        ),
        compiler_params=pltpu.CompilerParams(
            dimension_semantics=("parallel", "parallel", "parallel"),
            vmem_limit_bytes=vmem_limit),
    )(q, k, v)

    if not flat_ctx:
        ctx = jnp.transpose(ctx, (0, 2, 1, 3)).reshape(B, S, D)

    # -------- Kernel C: out_proj (K=D contraction) + residual + norm_2 -----
    x_out, m_out = pl.pallas_call(
        functools.partial(_outproj_norm_kernel, eps=eps),
        out_shape=(jax.ShapeDtypeStruct((B, S, D), x.dtype),
                   jax.ShapeDtypeStruct((B, S, D), x.dtype)),
        grid_spec=pltpu.PrefetchScalarGridSpec(
            num_scalar_prefetch=0,
            grid=(B, S // block_out, D // block_k),
            in_specs=[
                pl.BlockSpec((1, block_out, block_k), lambda b, s, k: (b, s, k)),
                pl.BlockSpec((1, block_out, D), lambda b, s, k: (b, s, 0)),
                pl.BlockSpec((block_k, D), lambda b, s, k: (k, 0)),
                pl.BlockSpec((1, D), lambda b, s, k: (0, 0)),
                pl.BlockSpec((1, D), lambda b, s, k: (0, 0)),
                pl.BlockSpec((1, D), lambda b, s, k: (0, 0)),
            ],
            out_specs=[
                pl.BlockSpec((1, block_out, D), lambda b, s, k: (b, s, 0)),
                pl.BlockSpec((1, block_out, D), lambda b, s, k: (b, s, 0)),
            ],
            scratch_shapes=[pltpu.VMEM((block_out, D), jnp.float32)],
        ),
        input_output_aliases={1: 0} if donate_x else {},
        compiler_params=pltpu.CompilerParams(
            dimension_semantics=("parallel", "parallel", "arbitrary"),
            vmem_limit_bytes=vmem_limit),
    )(ctx, x, wout_t, bout2, ln2w, ln2b)

    # attn_weights (output_attentions=False) and past_key_value are None.
    return x_out, m_out, None, None


# --------------------------------------------------------------------------
# Pure-JAX reference
# --------------------------------------------------------------------------
def _reference(x, params, *, n_heads, eps=1e-5):
    B, S, D = x.shape
    hd = D // n_heads
    scale = 1.0 / math.sqrt(hd)

    def ln(v, w, b):
        mu = jnp.mean(v, axis=-1, keepdims=True)
        var = jnp.mean((v - mu) ** 2, axis=-1, keepdims=True)
        return (v - mu) / jnp.sqrt(var + eps) * w + b

    a = ln(x, params["ln1_w"], params["ln1_b"])
    qkv = a @ params["wqkv"].T + params["bqkv"]
    q, k, v = jnp.split(qkv, 3, axis=-1)
    q = q.reshape(B, S, n_heads, hd).transpose(0, 2, 1, 3)
    k = k.reshape(B, S, n_heads, hd).transpose(0, 2, 1, 3)
    v = v.reshape(B, S, n_heads, hd).transpose(0, 2, 1, 3)
    s = jnp.einsum("bhqd,bhkd->bhqk", q, k) * scale
    mask = jnp.tril(jnp.ones((S, S), dtype=bool))
    s = jnp.where(mask, s, -1e30)
    p = jax.nn.softmax(s, axis=-1)
    ctx = jnp.einsum("bhqk,bhkd->bhqd", p, v).transpose(0, 2, 1, 3).reshape(B, S, D)
    attn_out = ctx @ params["wout"].T + params["bout"]
    x_new = x + attn_out
    m = ln(x_new, params["ln2_w"], params["ln2_b"])
    return x_new, m


if __name__ == "__main__":
    def make_params(key, d):
        ks = jax.random.split(key, 8)
        w = 0.1
        return {
            "ln1_w": 1.0 + 0.1 * jax.random.normal(ks[0], (d,), jnp.float32),
            "ln1_b": 0.1 * jax.random.normal(ks[1], (d,), jnp.float32),
            "wqkv": w * jax.random.normal(ks[2], (3 * d, d), jnp.float32),
            "bqkv": w * jax.random.normal(ks[3], (3 * d,), jnp.float32),
            "wout": w * jax.random.normal(ks[4], (d, d), jnp.float32),
            "bout": w * jax.random.normal(ks[5], (d,), jnp.float32),
            "ln2_w": 1.0 + 0.1 * jax.random.normal(ks[6], (d,), jnp.float32),
            "ln2_b": 0.1 * jax.random.normal(ks[7], (d,), jnp.float32),
        }

    # --- Case 1: fp32 compute, hd=16 (<128) -> head-major ctx fallback -----
    B, S, D, H = 2, 16, 64, 4
    params = make_params(jax.random.PRNGKey(0), D)
    x = jax.random.normal(jax.random.PRNGKey(1), (B, S, D), jnp.float32)
    x_ref, m_ref = _reference(x, params, n_heads=H, eps=1e-5)

    run_f32 = jax.jit(functools.partial(
        fused_norm_attention_norm, n_heads=H, eps=1e-5,
        compute_dtype=jnp.float32, block_s=8, block_q=8, block_out=8,
        block_k=64))
    x_out, m_out, attn_w, past_kv = run_f32(x, params)
    jax.block_until_ready((x_out, m_out))
    assert attn_w is None and past_kv is None
    assert jnp.allclose(x_out, x_ref, atol=1e-2, rtol=1e-2), "fp32 x mismatch"
    assert jnp.allclose(m_out, m_ref, atol=1e-2, rtol=1e-2), "fp32 m mismatch"

    # --- Case 2: bf16 compute, hd=128 -> lane-dense (B, S, D) ctx fast path -
    B2, S2, D2, H2 = 2, 32, 256, 2
    params2 = make_params(jax.random.PRNGKey(2), D2)
    x2 = jax.random.normal(jax.random.PRNGKey(3), (B2, S2, D2), jnp.float32)
    x2_ref, m2_ref = _reference(x2, params2, n_heads=H2, eps=1e-5)

    run_bf16 = jax.jit(functools.partial(
        fused_norm_attention_norm, n_heads=H2, eps=1e-5,
        compute_dtype=jnp.bfloat16, block_s=16, block_q=16, block_out=16,
        block_k=256))
    x2_out, m2_out, _, _ = run_bf16(x2, params2)
    jax.block_until_ready((x2_out, m2_out))
    assert jnp.allclose(x2_out, x2_ref, atol=8e-2, rtol=8e-2), "bf16 x mismatch"
    assert jnp.allclose(m2_out, m2_ref, atol=8e-2, rtol=8e-2), "bf16 m mismatch"

    print("KERNEL_OK")
</pallas_src>

<mosaic_0001>
module attributes {stable_mosaic.version = 11 : i64} {
  func.func @_flash_attn_kernel(%arg0: i32, %arg1: i32, %arg2: i32, %arg3: memref<1x1x8x16xf32, #tpu.memory_space<vmem>>, %arg4: memref<1x1x16x16xf32, #tpu.memory_space<vmem>>, %arg5: memref<1x1x16x16xf32, #tpu.memory_space<vmem>>, %arg6: memref<1x1x8x16xf32, #tpu.memory_space<vmem>>) attributes {dimension_semantics = [#tpu.dimension_semantics<parallel>, #tpu.dimension_semantics<parallel>, #tpu.dimension_semantics<parallel>], iteration_bounds = array<i64: 2, 4, 2>, scalar_prefetch = 0 : i64, scratch_operands = 0 : i64, tpu.core_type = #tpu.core_type<tc>, window_params = [{transform_indices = @transform_0, window_bounds = array<i64: 1, 1, 8, 16>}, {transform_indices = @transform_1, window_bounds = array<i64: 1, 1, 16, 16>}, {transform_indices = @transform_2, window_bounds = array<i64: 1, 1, 16, 16>}, {transform_indices = @transform_3, window_bounds = array<i64: 1, 1, 8, 16>}]} {
    %c0 = arith.constant 0 : index
    %c0_0 = arith.constant 0 : index
    %c0_1 = arith.constant 0 : index
    %c0_2 = arith.constant 0 : index
    %0 = vector.load %arg3[%c0, %c0_0, %c0_1, %c0_2] : memref<1x1x8x16xf32, #tpu.memory_space<vmem>>, vector<1x1x8x16xf32>
    %1 = vector.shape_cast %0 : vector<1x1x8x16xf32> to vector<8x16xf32>
    %cst = arith.constant -1.000000e+30 : f32
    %2 = vector.broadcast %cst : f32 to vector<8x1xf32>
    %cst_3 = arith.constant 0.000000e+00 : f32
    %3 = vector.broadcast %cst_3 : f32 to vector<8x1xf32>
    %cst_4 = arith.constant 0.000000e+00 : f32
    %4 = vector.broadcast %cst_4 : f32 to vector<8x16xf32>
    %c0_i32 = arith.constant 0 : i32
    %5 = arith.subi %arg2, %c0_i32 : i32
    %6 = arith.addi %c0_i32, %5 : i32
    %c1_i32 = arith.constant 1 : i32
    %7:3 = scf.for %arg7 = %c0_i32 to %6 step %c1_i32 iter_args(%arg8 = %2, %arg9 = %3, %arg10 = %4) -> (vector<8x1xf32>, vector<8x1xf32>, vector<8x16xf32>)  : i32 {
      %c8_i32_20 = arith.constant 8 : i32
      %43 = arith.muli %arg7, %c8_i32_20 : i32
      %44 = tpu.assume_multiple %43, 8 : i32
      %c0_21 = arith.constant 0 : index
      %c0_22 = arith.constant 0 : index
      %45 = arith.index_cast %44 : i32 to index
      %c0_23 = arith.constant 0 : index
      %46 = vector.load %arg4[%c0_21, %c0_22, %45, %c0_23] : memref<1x1x16x16xf32, #tpu.memory_space<vmem>>, vector<1x1x8x16xf32>
      %47 = vector.shape_cast %46 : vector<1x1x8x16xf32> to vector<8x16xf32>
      %c0_24 = arith.constant 0 : index
      %c0_25 = arith.constant 0 : index
      %48 = arith.index_cast %44 : i32 to index
      %c0_26 = arith.constant 0 : index
      %49 = vector.load %arg5[%c0_24, %c0_25, %48, %c0_26] : memref<1x1x16x16xf32, #tpu.memory_space<vmem>>, vector<1x1x8x16xf32>
      %50 = vector.shape_cast %49 : vector<1x1x8x16xf32> to vector<8x16xf32>
      "tpu.trace_start"() <{level = 10 : i32, message = "qd,kd->qk"}> : () -> ()
      %cst_27 = arith.constant dense<0.000000e+00> : vector<8x8xf32>
      %51 = tpu.matmul %1, %47, %cst_27 {dimension_numbers = #tpu.dot_dimension_numbers<[1], [1], [0], [0], [0, 0, 1, 0], [], []>} : vector<8x16xf32>, vector<8x16xf32>, vector<8x8xf32> -> vector<8x8xf32>
      "tpu.trace_stop"() : () -> ()
      %cst_28 = arith.constant dense<0xFF800000> : vector<8xf32>
      %52 = vector.multi_reduction <maximumf>, %51, %cst_28 [1] : vector<8x8xf32> to vector<8xf32>
      %53 = vector.shape_cast %52 : vector<8xf32> to vector<8x1xf32>
      %54 = arith.maximumf %arg8, %53 : vector<8x1xf32>
      %55 = arith.subf %arg8, %54 : vector<8x1xf32>
      %56 = math.exp %55 : vector<8x1xf32>
      %57 = vector.broadcast %54 : vector<8x1xf32> to vector<8x8xf32>
      %58 = arith.subf %51, %57 : vector<8x8xf32>
      %59 = math.exp %58 : vector<8x8xf32>
      %60 = arith.mulf %56, %arg9 : vector<8x1xf32>
      %cst_29 = arith.constant dense<0.000000e+00> : vector<8xf32>
      %61 = vector.multi_reduction <add>, %59, %cst_29 [1] : vector<8x8xf32> to vector<8xf32>
      %62 = vector.shape_cast %61 : vector<8xf32> to vector<8x1xf32>
      %63 = arith.addf %60, %62 : vector<8x1xf32>
      %64 = vector.broadcast %56 : vector<8x1xf32> to vector<8x16xf32>
      %65 = arith.mulf %64, %arg10 : vector<8x16xf32>
      %cst_30 = arith.constant dense<0.000000e+00> : vector<8x16xf32>
      %66 = tpu.matmul %59, %50, %cst_30 {dimension_numbers = #tpu.dot_dimension_numbers<[1], [0], [0], [1], [0, 0, 1, 1], [], []>} : vector<8x8xf32>, vector<8x16xf32>, vector<8x16xf32> -> vector<8x16xf32>
      %67 = arith.addf %65, %66 : vector<8x16xf32>
      scf.yield %54, %63, %67 : vector<8x1xf32>, vector<8x1xf32>, vector<8x16xf32>
    }
    %c8_i32 = arith.constant 8 : i32
    %8 = arith.muli %arg2, %c8_i32 : i32
    %9 = tpu.assume_multiple %8, 8 : i32
    %c0_5 = arith.constant 0 : index
    %c0_6 = arith.constant 0 : index
    %10 = arith.index_cast %9 : i32 to index
    %c0_7 = arith.constant 0 : index
    %11 = vector.load %arg4[%c0_5, %c0_6, %10, %c0_7] : memref<1x1x16x16xf32, #tpu.memory_space<vmem>>, vector<1x1x8x16xf32>
    %12 = vector.shape_cast %11 : vector<1x1x8x16xf32> to vector<8x16xf32>
    %c0_8 = arith.constant 0 : index
    %c0_9 = arith.constant 0 : index
    %13 = arith.index_cast %9 : i32 to index
    %c0_10 = arith.constant 0 : index
    %14 = vector.load %arg5[%c0_8, %c0_9, %13, %c0_10] : memref<1x1x16x16xf32, #tpu.memory_space<vmem>>, vector<1x1x8x16xf32>
    %15 = vector.shape_cast %14 : vector<1x1x8x16xf32> to vector<8x16xf32>
    "tpu.trace_start"() <{level = 10 : i32, message = "qd,kd->qk"}> : () -> ()
    %cst_11 = arith.constant dense<0.000000e+00> : vector<8x8xf32>
    %16 = tpu.matmul %1, %12, %cst_11 {dimension_numbers = #tpu.dot_dimension_numbers<[1], [1], [0], [0], [0, 0, 1, 0], [], []>} : vector<8x16xf32>, vector<8x16xf32>, vector<8x8xf32> -> vector<8x8xf32>
    "tpu.trace_stop"() : () -> ()
    %17 = tpu.iota {dimensions = array<i32: 0>} : vector<8x8xi32>
    %18 = tpu.iota {dimensions = array<i32: 1>} : vector<8x8xi32>
    %19 = arith.cmpi sle, %18, %17 : vector<8x8xi32>
    %cst_12 = arith.constant -1.000000e+30 : f32
    %20 = vector.broadcast %cst_12 : f32 to vector<8x8xf32>
    %21 = arith.select %19, %16, %20 : vector<8x8xi1>, vector<8x8xf32>
    %cst_13 = arith.constant dense<0xFF800000> : vector<8xf32>
    %22 = vector.multi_reduction <maximumf>, %21, %cst_13 [1] : vector<8x8xf32> to vector<8xf32>
    %23 = vector.shape_cast %22 : vector<8xf32> to vector<8x1xf32>
    %24 = arith.maximumf %7#0, %23 : vector<8x1xf32>
    %25 = arith.subf %7#0, %24 : vector<8x1xf32>
    %26 = math.exp %25 : vector<8x1xf32>
    %27 = vector.broadcast %24 : vector<8x1xf32> to vector<8x8xf32>
    %28 = arith.subf %21, %27 : vector<8x8xf32>
    %29 = math.exp %28 : vector<8x8xf32>
    %30 = arith.mulf %26, %7#1 : vector<8x1xf32>
    %cst_14 = arith.constant dense<0.000000e+00> : vector<8xf32>
    %31 = vector.multi_reduction <add>, %29, %cst_14 [1] : vector<8x8xf32> to vector<8xf32>
    %32 = vector.shape_cast %31 : vector<8xf32> to vector<8x1xf32>
    %33 = arith.addf %30, %32 : vector<8x1xf32>
    %34 = vector.broadcast %26 : vector<8x1xf32> to vector<8x16xf32>
    %35 = arith.mulf %34, %7#2 : vector<8x16xf32>
    %cst_15 = arith.constant dense<0.000000e+00> : vector<8x16xf32>
    %36 = tpu.matmul %29, %15, %cst_15 {dimension_numbers = #tpu.dot_dimension_numbers<[1], [0], [0], [1], [0, 0, 1, 1], [], []>} : vector<8x8xf32>, vector<8x16xf32>, vector<8x16xf32> -> vector<8x16xf32>
    %37 = arith.addf %35, %36 : vector<8x16xf32>
    %38 = tpu.reciprocal %33 {approx = true} : vector<8x1xf32> -> vector<8x1xf32>
    %39 = vector.broadcast %38 : vector<8x1xf32> to vector<8x16xf32>
    %40 = arith.mulf %37, %39 : vector<8x16xf32>
    %41 = vector.shape_cast %40 : vector<8x16xf32> to vector<1x1x8x16xf32>
    %c0_16 = arith.constant 0 : index
    %c0_17 = arith.constant 0 : index
    %c0_18 = arith.constant 0 : index
    %c0_19 = arith.constant 0 : index
    %42 = vector.load %arg6[%c0_16, %c0_17, %c0_18, %c0_19] : memref<1x1x8x16xf32, #tpu.memory_space<vmem>>, vector<1x1x8x16xf32>
    tpu.vector_store %arg6[%c0_16, %c0_17, %c0_18, %c0_19], %41 {strides = array<i32>} : memref<1x1x8x16xf32, #tpu.memory_space<vmem>>, vector<1x1x8x16xf32>,
    return
  }
  func.func @transform_0(%arg0: i32, %arg1: i32, %arg2: i32) -> (i32, i32, i32, i32) {
    %c0_i32 = arith.constant 0 : i32
    %c0_i32_0 = arith.constant 0 : i32
    return %arg0, %arg1, %arg2, %c0_i32 : i32, i32, i32, i32
  }
  func.func @transform_1(%arg0: i32, %arg1: i32, %arg2: i32) -> (i32, i32, i32, i32) {
    %c0_i32 = arith.constant 0 : i32
    %c0_i32_0 = arith.constant 0 : i32
    %c0_i32_1 = arith.constant 0 : i32
    return %arg0, %arg1, %c0_i32, %c0_i32_0 : i32, i32, i32, i32
  }
  func.func @transform_2(%arg0: i32, %arg1: i32, %arg2: i32) -> (i32, i32, i32, i32) {
    %c0_i32 = arith.constant 0 : i32
    %c0_i32_0 = arith.constant 0 : i32
    %c0_i32_1 = arith.constant 0 : i32
    return %arg0, %arg1, %c0_i32, %c0_i32_0 : i32, i32, i32, i32
  }
  func.func @transform_3(%arg0: i32, %arg1: i32, %arg2: i32) -> (i32, i32, i32, i32) {
    %c0_i32 = arith.constant 0 : i32
    %c0_i32_0 = arith.constant 0 : i32
    return %arg0, %arg1, %arg2, %c0_i32 : i32, i32, i32, i32
  }
}

module attributes {stable_mosaic.version = 11 : i64} {
  func.func @_ln_qkv_kernel(%arg0: i32, %arg1: i32, %arg2: i32, %arg3: memref<1x8x64xf32, #tpu.memory_space<vmem>>, %arg4: memref<1x64xf32, #tpu.memory_space<vmem>>, %arg5: memref<1x64xf32, #tpu.memory_space<vmem>>, %arg6: memref<1x64x48xf32, #tpu.memory_space<vmem>>, %arg7: memref<1x1x48xf32, #tpu.memory_space<vmem>>, %arg8: memref<1x1x8x16xf32, #tpu.memory_space<vmem>>, %arg9: memref<1x1x8x16xf32, #tpu.memory_space<vmem>>, %arg10: memref<1x1x8x16xf32, #tpu.memory_space<vmem>>, %arg11: memref<8x64xf32, #tpu.memory_space<vmem>>) attributes {dimension_semantics = [#tpu.dimension_semantics<parallel>, #tpu.dimension_semantics<parallel>, #tpu.dimension_semantics<arbitrary>], iteration_bounds = array<i64: 2, 2, 4>, scalar_prefetch = 0 : i64, scratch_operands = 1 : i64, tpu.core_type = #tpu.core_type<tc>, window_params = [{transform_indices = @transform_0, window_bounds = array<i64: 1, 8, 64>}, {pipeline_mode = #tpu.pipeline_mode<synchronous>, transform_indices = @transform_1, window_bounds = array<i64: 1, 64>}, {pipeline_mode = #tpu.pipeline_mode<synchronous>, transform_indices = @transform_2, window_bounds = array<i64: 1, 64>}, {transform_indices = @transform_3, window_bounds = array<i64: 1, 64, 48>}, {transform_indices = @transform_4, window_bounds = array<i64: 1, 1, 48>}, {transform_indices = @transform_5, window_bounds = array<i64: 1, 1, 8, 16>}, {transform_indices = @transform_6, window_bounds = array<i64: 1, 1, 8, 16>}, {transform_indices = @transform_7, window_bounds = array<i64: 1, 1, 8, 16>}]} {
    %c0_i32 = arith.constant 0 : i32
    %0 = arith.cmpi eq, %arg2, %c0_i32 : i32
    %1 = arith.extui %0 : i1 to i32
    %c0_i32_0 = arith.constant 0 : i32
    %2 = arith.cmpi ne, %1, %c0_i32_0 : i32
    scf.if %2 {
      %c0_20 = arith.constant 0 : index
      %c0_21 = arith.constant 0 : index
      %c0_22 = arith.constant 0 : index
      %23 = vector.load %arg3[%c0_20, %c0_21, %c0_22] : memref<1x8x64xf32, #tpu.memory_space<vmem>>, vector<1x8x64xf32>
      %24 = vector.shape_cast %23 : vector<1x8x64xf32> to vector<8x64xf32>
      %c0_23 = arith.constant 0 : index
      %c0_24 = arith.constant 0 : index
      %25 = vector.load %arg4[%c0_23, %c0_24] : memref<1x64xf32, #tpu.memory_space<vmem>>, vector<1x64xf32>
      %c0_25 = arith.constant 0 : index
      %c0_26 = arith.constant 0 : index
      %26 = vector.load %arg5[%c0_25, %c0_26] : memref<1x64xf32, #tpu.memory_space<vmem>>, vector<1x64xf32>
      %cst_27 = arith.constant dense<0.000000e+00> : vector<8xf32>
      %27 = vector.multi_reduction <add>, %24, %cst_27 [1] : vector<8x64xf32> to vector<8xf32>
      %28 = vector.shape_cast %27 : vector<8xf32> to vector<8x1xf32>
      %cst_28 = arith.constant 6.400000e+01 : f32
      %29 = vector.broadcast %cst_28 : f32 to vector<8x1xf32>
      %30 = arith.divf %28, %29 : vector<8x1xf32>
      %31 = vector.broadcast %30 : vector<8x1xf32> to vector<8x64xf32>
      %32 = arith.subf %24, %31 : vector<8x64xf32>
      %33 = arith.mulf %32, %32 : vector<8x64xf32>
      %cst_29 = arith.constant dense<0.000000e+00> : vector<8xf32>
      %34 = vector.multi_reduction <add>, %33, %cst_29 [1] : vector<8x64xf32> to vector<8xf32>
      %35 = vector.shape_cast %34 : vector<8xf32> to vector<8x1xf32>
      %cst_30 = arith.constant 6.400000e+01 : f32
      %36 = vector.broadcast %cst_30 : f32 to vector<8x1xf32>
      %37 = arith.divf %35, %36 : vector<8x1xf32>
      %38 = vector.broadcast %30 : vector<8x1xf32> to vector<8x64xf32>
      %39 = arith.subf %24, %38 : vector<8x64xf32>
      %cst_31 = arith.constant 9.99999974E-6 : f32
      %40 = vector.broadcast %cst_31 : f32 to vector<8x1xf32>
      %41 = arith.addf %37, %40 : vector<8x1xf32>
      %42 = math.rsqrt %41 : vector<8x1xf32>
      %43 = vector.broadcast %42 : vector<8x1xf32> to vector<8x64xf32>
      %44 = arith.mulf %39, %43 : vector<8x64xf32>
      %45 = vector.broadcast %25 : vector<1x64xf32> to vector<8x64xf32>
      %46 = arith.mulf %44, %45 : vector<8x64xf32>
      %47 = vector.broadcast %26 : vector<1x64xf32> to vector<8x64xf32>
      %48 = arith.addf %46, %47 : vector<8x64xf32>
      %c0_32 = arith.constant 0 : index
      %c0_33 = arith.constant 0 : index
      %49 = vector.load %arg11[%c0_32, %c0_33] : memref<8x64xf32, #tpu.memory_space<vmem>>, vector<8x64xf32>
      tpu.vector_store %arg11[%c0_32, %c0_33], %48 {strides = array<i32>} : memref<8x64xf32, #tpu.memory_space<vmem>>, vector<8x64xf32>,
    } else {
    }
    %c0 = arith.constant 0 : index
    %c0_1 = arith.constant 0 : index
    %3 = vector.load %arg11[%c0, %c0_1] : memref<8x64xf32, #tpu.memory_space<vmem>>, vector<8x64xf32>
    %c0_2 = arith.constant 0 : index
    %c0_3 = arith.constant 0 : index
    %c0_4 = arith.constant 0 : index
    %4 = vector.load %arg6[%c0_2, %c0_3, %c0_4] : memref<1x64x48xf32, #tpu.memory_space<vmem>>, vector<1x64x48xf32>
    %5 = vector.shape_cast %4 : vector<1x64x48xf32> to vector<64x48xf32>
    %cst = arith.constant dense<0.000000e+00> : vector<8x48xf32>
    %6 = tpu.matmul %3, %5, %cst {dimension_numbers = #tpu.dot_dimension_numbers<[1], [0], [0], [1], [0, 0, 1, 1], [], []>} : vector<8x64xf32>, vector<64x48xf32>, vector<8x48xf32> -> vector<8x48xf32>
    %c0_5 = arith.constant 0 : index
    %c0_6 = arith.constant 0 : index
    %c0_7 = arith.constant 0 : index
    %7 = vector.load %arg7[%c0_5, %c0_6, %c0_7] : memref<1x1x48xf32, #tpu.memory_space<vmem>>, vector<1x1x48xf32>
    %8 = vector.shape_cast %7 : vector<1x1x48xf32> to vector<1x48xf32>
    %9 = vector.broadcast %8 : vector<1x48xf32> to vector<8x48xf32>
    %10 = arith.addf %6, %9 : vector<8x48xf32>
    %11 = vector.extract_strided_slice %10 {offsets = [0, 0], sizes = [8, 16], strides = [1, 1]} : vector<8x48xf32> to vector<8x16xf32>
    %c0_8 = arith.constant 0 : index
    %c0_9 = arith.constant 0 : index
    %c0_10 = arith.constant 0 : index
    %c0_11 = arith.constant 0 : index
    %12 = vector.load %arg8[%c0_8, %c0_9, %c0_10, %c0_11] : memref<1x1x8x16xf32, #tpu.memory_space<vmem>>, vector<1x1x8x16xf32>
    %13 = vector.shape_cast %12 : vector<1x1x8x16xf32> to vector<8x16xf32>
    %14 = vector.shape_cast %11 : vector<8x16xf32> to vector<1x1x8x16xf32>
    tpu.vector_store %arg8[%c0_8, %c0_9, %c0_10, %c0_11], %14 {strides = array<i32>} : memref<1x1x8x16xf32, #tpu.memory_space<vmem>>, vector<1x1x8x16xf32>,
    %15 = vector.extract_strided_slice %10 {offsets = [0, 16], sizes = [8, 16], strides = [1, 1]} : vector<8x48xf32> to vector<8x16xf32>
    %c0_12 = arith.constant 0 : index
    %c0_13 = arith.constant 0 : index
    %c0_14 = arith.constant 0 : index
    %c0_15 = arith.constant 0 : index
    %16 = vector.load %arg9[%c0_12, %c0_13, %c0_14, %c0_15] : memref<1x1x8x16xf32, #tpu.memory_space<vmem>>, vector<1x1x8x16xf32>
    %17 = vector.shape_cast %16 : vector<1x1x8x16xf32> to vector<8x16xf32>
    %18 = vector.shape_cast %15 : vector<8x16xf32> to vector<1x1x8x16xf32>
    tpu.vector_store %arg9[%c0_12, %c0_13, %c0_14, %c0_15], %18 {strides = array<i32>} : memref<1x1x8x16xf32, #tpu.memory_space<vmem>>, vector<1x1x8x16xf32>,
    %19 = vector.extract_strided_slice %10 {offsets = [0, 32], sizes = [8, 16], strides = [1, 1]} : vector<8x48xf32> to vector<8x16xf32>
    %c0_16 = arith.constant 0 : index
    %c0_17 = arith.constant 0 : index
    %c0_18 = arith.constant 0 : index
    %c0_19 = arith.constant 0 : index
    %20 = vector.load %arg10[%c0_16, %c0_17, %c0_18, %c0_19] : memref<1x1x8x16xf32, #tpu.memory_space<vmem>>, vector<1x1x8x16xf32>
    %21 = vector.shape_cast %20 : vector<1x1x8x16xf32> to vector<8x16xf32>
    %22 = vector.shape_cast %19 : vector<8x16xf32> to vector<1x1x8x16xf32>
    tpu.vector_store %arg10[%c0_16, %c0_17, %c0_18, %c0_19], %22 {strides = array<i32>} : memref<1x1x8x16xf32, #tpu.memory_space<vmem>>, vector<1x1x8x16xf32>,
    return
  }
  func.func @transform_0(%arg0: i32, %arg1: i32, %arg2: i32) -> (i32, i32, i32) {
    %c0_i32 = arith.constant 0 : i32
    %c0_i32_0 = arith.constant 0 : i32
    return %arg0, %arg1, %c0_i32 : i32, i32, i32
  }
  func.func @transform_1(%arg0: i32, %arg1: i32, %arg2: i32) -> (i32, i32) {
    %c0_i32 = arith.constant 0 : i32
    %c0_i32_0 = arith.constant 0 : i32
    %c0_i32_1 = arith.constant 0 : i32
    return %c0_i32, %c0_i32_0 : i32, i32
  }
  func.func @transform_2(%arg0: i32, %arg1: i32, %arg2: i32) -> (i32, i32) {
    %c0_i32 = arith.constant 0 : i32
    %c0_i32_0 = arith.constant 0 : i32
    %c0_i32_1 = arith.constant 0 : i32
    return %c0_i32, %c0_i32_0 : i32, i32
  }
  func.func @transform_3(%arg0: i32, %arg1: i32, %arg2: i32) -> (i32, i32, i32) {
    %c0_i32 = arith.constant 0 : i32
    %c0_i32_0 = arith.constant 0 : i32
    %c0_i32_1 = arith.constant 0 : i32
    return %arg2, %c0_i32, %c0_i32_0 : i32, i32, i32
  }
  func.func @transform_4(%arg0: i32, %arg1: i32, %arg2: i32) -> (i32, i32, i32) {
    %c0_i32 = arith.constant 0 : i32
    %c0_i32_0 = arith.constant 0 : i32
    %c0_i32_1 = arith.constant 0 : i32
    return %arg2, %c0_i32, %c0_i32_0 : i32, i32, i32
  }
  func.func @transform_5(%arg0: i32, %arg1: i32, %arg2: i32) -> (i32, i32, i32, i32) {
    %c0_i32 = arith.constant 0 : i32
    %c0_i32_0 = arith.constant 0 : i32
    return %arg0, %arg2, %arg1, %c0_i32 : i32, i32, i32, i32
  }
  func.func @transform_6(%arg0: i32, %arg1: i32, %arg2: i32) -> (i32, i32, i32, i32) {
    %c0_i32 = arith.constant 0 : i32
    %c0_i32_0 = arith.constant 0 : i32
    return %arg0, %arg2, %arg1, %c0_i32 : i32, i32, i32, i32
  }
  func.func @transform_7(%arg0: i32, %arg1: i32, %arg2: i32) -> (i32, i32, i32, i32) {
    %c0_i32 = arith.constant 0 : i32
    %c0_i32_0 = arith.constant 0 : i32
    return %arg0, %arg2, %arg1, %c0_i32 : i32, i32, i32, i32
  }
}

module attributes {stable_mosaic.version = 11 : i64} {
  func.func @_outproj_norm_kernel(%arg0: i32, %arg1: i32, %arg2: i32, %arg3: memref<1x8x64xf32, #tpu.memory_space<vmem>>, %arg4: memref<1x8x64xf32, #tpu.memory_space<vmem>>, %arg5: memref<64x64xf32, #tpu.memory_space<vmem>>, %arg6: memref<1x64xf32, #tpu.memory_space<vmem>>, %arg7: memref<1x64xf32, #tpu.memory_space<vmem>>, %arg8: memref<1x64xf32, #tpu.memory_space<vmem>>, %arg9: memref<1x8x64xf32, #tpu.memory_space<vmem>>, %arg10: memref<1x8x64xf32, #tpu.memory_space<vmem>>, %arg11: memref<8x64xf32, #tpu.memory_space<vmem>>) attributes {dimension_semantics = [#tpu.dimension_semantics<parallel>, #tpu.dimension_semantics<parallel>, #tpu.dimension_semantics<arbitrary>], iteration_bounds = array<i64: 2, 2, 1>, scalar_prefetch = 0 : i64, scratch_operands = 1 : i64, tpu.core_type = #tpu.core_type<tc>, window_params = [{transform_indices = @transform_0, window_bounds = array<i64: 1, 8, 64>}, {transform_indices = @transform_1, window_bounds = array<i64: 1, 8, 64>}, {transform_indices = @transform_2, window_bounds = array<i64: 64, 64>}, {pipeline_mode = #tpu.pipeline_mode<synchronous>, transform_indices = @transform_3, window_bounds = array<i64: 1, 64>}, {pipeline_mode = #tpu.pipeline_mode<synchronous>, transform_indices = @transform_4, window_bounds = array<i64: 1, 64>}, {pipeline_mode = #tpu.pipeline_mode<synchronous>, transform_indices = @transform_5, window_bounds = array<i64: 1, 64>}, {transform_indices = @transform_6, window_bounds = array<i64: 1, 8, 64>}, {transform_indices = @transform_7, window_bounds = array<i64: 1, 8, 64>}]} {
    %c0_i32 = arith.constant 0 : i32
    %0 = arith.cmpi eq, %arg2, %c0_i32 : i32
    %1 = arith.extui %0 : i1 to i32
    %c0_i32_0 = arith.constant 0 : i32
    %2 = arith.cmpi ne, %1, %c0_i32_0 : i32
    scf.if %2 {
      %cst_11 = arith.constant 0.000000e+00 : f32
      %13 = vector.broadcast %cst_11 : f32 to vector<8x64xf32>
      %c0_12 = arith.constant 0 : index
      %c0_13 = arith.constant 0 : index
      %14 = vector.load %arg11[%c0_12, %c0_13] : memref<8x64xf32, #tpu.memory_space<vmem>>, vector<8x64xf32>
      tpu.vector_store %arg11[%c0_12, %c0_13], %13 {strides = array<i32>} : memref<8x64xf32, #tpu.memory_space<vmem>>, vector<8x64xf32>,
    } else {
    }
    %c0 = arith.constant 0 : index
    %c0_1 = arith.constant 0 : index
    %3 = vector.load %arg11[%c0, %c0_1] : memref<8x64xf32, #tpu.memory_space<vmem>>, vector<8x64xf32>
    %c0_2 = arith.constant 0 : index
    %c0_3 = arith.constant 0 : index
    %c0_4 = arith.constant 0 : index
    %4 = vector.load %arg3[%c0_2, %c0_3, %c0_4] : memref<1x8x64xf32, #tpu.memory_space<vmem>>, vector<1x8x64xf32>
    %5 = vector.shape_cast %4 : vector<1x8x64xf32> to vector<8x64xf32>
    %c0_5 = arith.constant 0 : index
    %c0_6 = arith.constant 0 : index
    %6 = vector.load %arg5[%c0_5, %c0_6] : memref<64x64xf32, #tpu.memory_space<vmem>>, vector<64x64xf32>
    %cst = arith.constant dense<0.000000e+00> : vector<8x64xf32>
    %7 = tpu.matmul %5, %6, %cst {dimension_numbers = #tpu.dot_dimension_numbers<[1], [0], [0], [1], [0, 0, 1, 1], [], []>} : vector<8x64xf32>, vector<64x64xf32>, vector<8x64xf32> -> vector<8x64xf32>
    %8 = arith.addf %3, %7 : vector<8x64xf32>
    %c0_7 = arith.constant 0 : index
    %c0_8 = arith.constant 0 : index
    %9 = vector.load %arg11[%c0_7, %c0_8] : memref<8x64xf32, #tpu.memory_space<vmem>>, vector<8x64xf32>
    tpu.vector_store %arg11[%c0_7, %c0_8], %8 {strides = array<i32>} : memref<8x64xf32, #tpu.memory_space<vmem>>, vector<8x64xf32>,
    %c0_i32_9 = arith.constant 0 : i32
    %10 = arith.cmpi eq, %arg2, %c0_i32_9 : i32
    %11 = arith.extui %10 : i1 to i32
    %c0_i32_10 = arith.constant 0 : i32
    %12 = arith.cmpi ne, %11, %c0_i32_10 : i32
    scf.if %12 {
      %c0_11 = arith.constant 0 : index
      %c0_12 = arith.constant 0 : index
      %c0_13 = arith.constant 0 : index
      %13 = vector.load %arg4[%c0_11, %c0_12, %c0_13] : memref<1x8x64xf32, #tpu.memory_space<vmem>>, vector<1x8x64xf32>
      %14 = vector.shape_cast %13 : vector<1x8x64xf32> to vector<8x64xf32>
      %c0_14 = arith.constant 0 : index
      %c0_15 = arith.constant 0 : index
      %15 = vector.load %arg11[%c0_14, %c0_15] : memref<8x64xf32, #tpu.memory_space<vmem>>, vector<8x64xf32>
      %16 = arith.addf %14, %15 : vector<8x64xf32>
      %c0_16 = arith.constant 0 : index
      %c0_17 = arith.constant 0 : index
      %17 = vector.load %arg6[%c0_16, %c0_17] : memref<1x64xf32, #tpu.memory_space<vmem>>, vector<1x64xf32>
      %18 = vector.broadcast %17 : vector<1x64xf32> to vector<8x64xf32>
      %19 = arith.addf %16, %18 : vector<8x64xf32>
      %c0_18 = arith.constant 0 : index
      %c0_19 = arith.constant 0 : index
      %c0_20 = arith.constant 0 : index
      %20 = vector.load %arg9[%c0_18, %c0_19, %c0_20] : memref<1x8x64xf32, #tpu.memory_space<vmem>>, vector<1x8x64xf32>
      %21 = vector.shape_cast %20 : vector<1x8x64xf32> to vector<8x64xf32>
      %22 = vector.shape_cast %19 : vector<8x64xf32> to vector<1x8x64xf32>
      tpu.vector_store %arg9[%c0_18, %c0_19, %c0_20], %22 {strides = array<i32>} : memref<1x8x64xf32, #tpu.memory_space<vmem>>, vector<1x8x64xf32>,
      %c0_21 = arith.constant 0 : index
      %c0_22 = arith.constant 0 : index
      %23 = vector.load %arg7[%c0_21, %c0_22] : memref<1x64xf32, #tpu.memory_space<vmem>>, vector<1x64xf32>
      %c0_23 = arith.constant 0 : index
      %c0_24 = arith.constant 0 : index
      %24 = vector.load %arg8[%c0_23, %c0_24] : memref<1x64xf32, #tpu.memory_space<vmem>>, vector<1x64xf32>
      %cst_25 = arith.constant dense<0.000000e+00> : vector<8xf32>
      %25 = vector.multi_reduction <add>, %19, %cst_25 [1] : vector<8x64xf32> to vector<8xf32>
      %26 = vector.shape_cast %25 : vector<8xf32> to vector<8x1xf32>
      %cst_26 = arith.constant 6.400000e+01 : f32
      %27 = vector.broadcast %cst_26 : f32 to vector<8x1xf32>
      %28 = arith.divf %26, %27 : vector<8x1xf32>
      %29 = vector.broadcast %28 : vector<8x1xf32> to vector<8x64xf32>
      %30 = arith.subf %19, %29 : vector<8x64xf32>
      %31 = arith.mulf %30, %30 : vector<8x64xf32>
      %cst_27 = arith.constant dense<0.000000e+00> : vector<8xf32>
      %32 = vector.multi_reduction <add>, %31, %cst_27 [1] : vector<8x64xf32> to vector<8xf32>
      %33 = vector.shape_cast %32 : vector<8xf32> to vector<8x1xf32>
      %cst_28 = arith.constant 6.400000e+01 : f32
      %34 = vector.broadcast %cst_28 : f32 to vector<8x1xf32>
      %35 = arith.divf %33, %34 : vector<8x1xf32>
      %36 = vector.broadcast %28 : vector<8x1xf32> to vector<8x64xf32>
      %37 = arith.subf %19, %36 : vector<8x64xf32>
      %cst_29 = arith.constant 9.99999974E-6 : f32
      %38 = vector.broadcast %cst_29 : f32 to vector<8x1xf32>
      %39 = arith.addf %35, %38 : vector<8x1xf32>
      %40 = math.rsqrt %39 : vector<8x1xf32>
      %41 = vector.broadcast %40 : vector<8x1xf32> to vector<8x64xf32>
      %42 = arith.mulf %37, %41 : vector<8x64xf32>
      %43 = vector.broadcast %23 : vector<1x64xf32> to vector<8x64xf32>
      %44 = arith.mulf %42, %43 : vector<8x64xf32>
      %45 = vector.broadcast %24 : vector<1x64xf32> to vector<8x64xf32>
      %46 = arith.addf %44, %45 : vector<8x64xf32>
      %c0_30 = arith.constant 0 : index
      %c0_31 = arith.constant 0 : index
      %c0_32 = arith.constant 0 : index
      %47 = vector.load %arg10[%c0_30, %c0_31, %c0_32] : memref<1x8x64xf32, #tpu.memory_space<vmem>>, vector<1x8x64xf32>
      %48 = vector.shape_cast %47 : vector<1x8x64xf32> to vector<8x64xf32>
      %49 = vector.shape_cast %46 : vector<8x64xf32> to vector<1x8x64xf32>
      tpu.vector_store %arg10[%c0_30, %c0_31, %c0_32], %49 {strides = array<i32>} : memref<1x8x64xf32, #tpu.memory_space<vmem>>, vector<1x8x64xf32>,
    } else {
    }
    return
  }
  func.func @transform_0(%arg0: i32, %arg1: i32, %arg2: i32) -> (i32, i32, i32) {
    %c0_i32 = arith.constant 0 : i32
    return %arg0, %arg1, %arg2 : i32, i32, i32
  }
  func.func @transform_1(%arg0: i32, %arg1: i32, %arg2: i32) -> (i32, i32, i32) {
    %c0_i32 = arith.constant 0 : i32
    %c0_i32_0 = arith.constant 0 : i32
    return %arg0, %arg1, %c0_i32 : i32, i32, i32
  }
  func.func @transform_2(%arg0: i32, %arg1: i32, %arg2: i32) -> (i32, i32) {
    %c0_i32 = arith.constant 0 : i32
    %c0_i32_0 = arith.constant 0 : i32
    return %arg2, %c0_i32 : i32, i32
  }
  func.func @transform_3(%arg0: i32, %arg1: i32, %arg2: i32) -> (i32, i32) {
    %c0_i32 = arith.constant 0 : i32
    %c0_i32_0 = arith.constant 0 : i32
    %c0_i32_1 = arith.constant 0 : i32
    return %c0_i32, %c0_i32_0 : i32, i32
  }
  func.func @transform_4(%arg0: i32, %arg1: i32, %arg2: i32) -> (i32, i32) {
    %c0_i32 = arith.constant 0 : i32
    %c0_i32_0 = arith.constant 0 : i32
    %c0_i32_1 = arith.constant 0 : i32
    return %c0_i32, %c0_i32_0 : i32, i32
  }
  func.func @transform_5(%arg0: i32, %arg1: i32, %arg2: i32) -> (i32, i32) {
    %c0_i32 = arith.constant 0 : i32
    %c0_i32_0 = arith.constant 0 : i32
    %c0_i32_1 = arith.constant 0 : i32
    return %c0_i32, %c0_i32_0 : i32, i32
  }
  func.func @transform_6(%arg0: i32, %arg1: i32, %arg2: i32) -> (i32, i32, i32) {
    %c0_i32 = arith.constant 0 : i32
    %c0_i32_0 = arith.constant 0 : i32
    return %arg0, %arg1, %c0_i32 : i32, i32, i32
  }
  func.func @transform_7(%arg0: i32, %arg1: i32, %arg2: i32) -> (i32, i32, i32) {
    %c0_i32 = arith.constant 0 : i32
    %c0_i32_0 = arith.constant 0 : i32
    return %arg0, %arg1, %c0_i32 : i32, i32, i32
  }
}

</mosaic_0001>

<bundles_post_ra>
// kernel: fused_norm_attention_norm.4
= control target key start
LH: loop header
LB: loop body
LE: loop exit
PB: predicated region body
PF: predicated region fallthrough
CT: control target
= control target key end

     0   :  { %s1162_s12 = smov 0   ;;  %s1164_s13 = smov 0   ;;  %s1292_s0 = inlined_call_operand.vmem [shape: f32[2,4,16,16], index: 0, kind: input, shape index: {}]   ;;  %s1293_s1 = inlined_call_operand.vmem [shape: f32[2,4,16,16], index: 1, kind: input, shape index: {}]   ;;  %s1294_s2 = inlined_call_operand.vmem [shape: f32[2,4,16,16], index: 2, kind: input, shape index: {}]   ;;  %s1295_s3 = inlined_call_operand.vmem [shape: f32[2,4,16,16], index: 3, kind: output, shape index: {}]  }
   0x1   :  { %s1166_s14 = smov 0   ;;  %s1168_s15 = smov 0  }
   0x2   :  { %s1170_s16 = smov 0   ;;  %s1172_s17 = smov 0  }
   0x3   :  { %s1174_s18 = smov 0  }
   0x4 LB: > { %s25_s19 = sadd.s32 1, %s1096_s15  ;;  %s28_s20 = sadd.s32 1, %s1100_s16  ;;  %s1108_s18 = sphi %s1174_s18, %s13_s18   ;;  %s1104_s17 = sphi %s1172_s17, %s1304_s17   ;;  %s1100_s16 = sphi %s1170_s16, %s1303_s16   ;;  %s1096_s15 = sphi %s1168_s15, %s1302_s15   ;;  %s1092_s14 = sphi %s1166_s14, %s1301_s14   ;;  %s1088_s13 = sphi %s1164_s13, %s1300_s13   ;;  %s1084_s12 = sphi %s1162_s12, %s1299_s12  }
   0x5   : > { %p26_p0 = scmp.ge.s32.totalorder %s25_s19, 2  ;;  %p848_p1 = scmp.ge.s32.totalorder %s1108_s18, 1 }
   0x6   : > { %p203_p2 = scmp.lt.s32.totalorder %s1108_s18, 17  ;;  %s32_s21 = sadd.s32 1, %s1104_s17 }
   0x7   : > { %s1306_s19 = smov (%p26_p0, %s25_s19), 0  ;;  %s1308_s20 = smov (!%p26_p0, %s28_s20), %s1100_s16 }
   0x8   : > { %p204_p3 = pnand %p848_p1, %p203_p2  ;;  %p30_p4 = scmp.ge.s32.totalorder %s1308_s20, 4 }
   0x9   : > { %p259_p6 = scmp.lt.s32.totalorder (!%p204_p3), %s1092_s14, 1  ;;  %p261_p7 = scmp.lt.s32.totalorder (!%p204_p3), %s1088_s13, 3  ;;  %v1229_v1 = vmov (!%p204_p3), 0.0   ;;  %v1231_v2 = vmov (!%p204_p3), 0.0   ;;  %v1233_v3 = vmov (!%p204_p3), -1e+30  }
   0xa   : > { %s1310_s20 = smov (%p30_p4, %s1308_s20), 0  ;;  %s1312_s21 = smov (!%p30_p4, %s32_s21), %s1104_s17 }
   0xb   : > { %p34_p5 = scmp.ge.s32.totalorder %s1312_s21, 2  ;;  %207 = sbr.rel (%p204_p3) target bundleno = 1221 (0x4c5), region = 32 }
   0xc   : > { %p263_p8 = scmp.lt.s32.totalorder (!%p204_p3), %s1084_s12, 1  ;;  %p861_p9 = scmp.le.s32.totalorder (!%p204_p3), %s1084_s12, 0 }
   0xd   : > { %s1314_s21 = smov (%p34_p5, %s1312_s21), 0 }
  0x12   : > { %s1316_s14 = smov (!%p259_p6, %s1092_s14), 1  ;;  %s1318_s13 = smov (!%p261_p7, %s1088_s13), 3 }
  0x13   : > { %s264_s22 = scalar_select %p263_p8, %s1084_s12, 1 }
  0x14   : > { %s849_s23 = sshll.u32 %s1318_s13, 1  ;;  %s850_s24 = sshll.u32 %s1316_s14, 3  ;;  %v1110_v4 = vmov (!%p861_p9), 0.0   ;;  %v1114_v5 = vmov (!%p861_p9), 0.0   ;;  %v1118_v6 = vmov (!%p861_p9), -1e+30  }
  0x15   : > { %s266_s25 = sadd.s32 %s849_s23, %s264_s22  ;;  %s277_s26 = sadd.s32 %s850_s24, %s849_s23 }
  0x16   : > { %s268_s27 = sadd.s32 %s850_s24, %s266_s25  ;;  %s854_s28 = sshll.u32 %s277_s26, 3 }
  0x17   : > { %s851_s29 = sshll.u32 %s268_s27, 3  ;;  %s1211_s5 = scalar_lea.vmem %s1293_s1, %s854_s28 }
  0x18   : > { %s270_s8 = scalar_lea.vmem %s1292_s0, %s851_s29  ;;  %s1219_s11 = scalar_lea.vmem %s1294_s2, %s854_s28 }
  0x19   : > { %s1224_s22 = scalar_lea.vmem %s1295_s3, %s851_s29  ;;  %v1226_v0 = vld [vmem:[%s270_s8] sm:$0xff]  ;;  %786 = sbr.rel (%p861_p9) target bundleno = 625 (0x271), region = 73 }
  0x1a   : > { %s1235_s23 = smov (!%p861_p9), 0  }
  0x20 LB: >> { %v1138_v7 = vmov 0.0   ;;  %vm1139_vm0 = vmmov 0   ;;  %s862_s24 = sshll.u32 %s1124_s23, 3  ;;  %vm316_vm1 = vcmask 130048   ;;  %vm393_vm2 = vcmask 64512   ;;  %s305_s23 = sadd.s32 1, %s1124_s23   ;;  %s1124_s23 = sphi %s1235_s23, %s305_s23   ;;  %v1120_v6 = vphi %v1118_v6, %v1119_v6   ;;  %v1116_v5 = vphi %v1114_v5, %v1115_v5   ;;  %v1112_v4 = vphi %v1110_v4, %v1111_v4  }
  0x21   : >> { %880 = vmatprep.subr.mxu0 %v1138_v7  ;;  %882 = vmatprep.mubr.msk.f32.mxu0 %vm1139_vm0, %v1138_v7  ;;  %s312_s25 = scalar_lea.vmem %s1211_s5, %s862_s24  ;;  %s314_s26 = scalar_lea.vmem %s1219_s11, %s862_s24 }
  0x22   : >> { %885 = vmatprep.subr.mxu1 %v1138_v7  ;;  %887 = vmatprep.mubr.msk.f32.mxu1 %vm1139_vm0, %v1138_v7  ;;  %v313_v8 = vld [vmem:[%s312_s25] sm:$0xff]  ;;  %p304_p10 = scmp.ge.s32.totalorder %s305_s23, %s1084_s12 }
  0x23   : >> { %881 = vmatpush3.xpose.msk.msra.mxu0 %vm316_vm1, %v313_v8  ;;  %v315_v12 = vld [vmem:[%s314_s26] sm:$0xff] }
  0x24   : >> { %886 = vmatpush3.msra.mxu1 %v315_v12 }
  0x26   : >> { %883 = vmatmul.mubr.msk.f32.vlgmr.msra.gmra.mrb[0].mxu0 %vm316_vm1, %v1226_v0 }
  0xf9   : >> { %v389_v9 = vpop.f32.mrb[0].mxu0 }
  0xfa   : >> { %v884_v10 = vpop.f32.mrb[1].mxu0  ;;  %v394_v11 = vsel %vm393_vm2, %v389_v9, -inf }
  0xfb   : >> { %395 = vmax.xlane.f32.xlu0 %v394_v11 }
 0x188   : >> { %v396_v13 = vpop.xlane.xlu0 %395 }
 0x189   : >> { %v397_v14 = vmax.f32 %v1120_v6, %v396_v13  }
 0x18b   : >> { %v398_v15 = vsub.f32 %v1120_v6, %v397_v14  ;;  %v401_v16 = vsub.f32 %v389_v9, %v397_v14  ;;  %v1119_v6 = vmov %v397_v14   ;;  %v1298_v3 = vmov (%p304_p10), %v397_v14 }
 0x18d   : >> { %v402_v17 = vmul.f32 1.442695, %v401_v16  ;;  %v399_v20 = vmul.f32 1.442695, %v398_v15 }
 0x18f   : >> { %1016 = vpow2.f32 %v402_v17 }
 0x190   : >> { %1018 = vpow2.f32 %v399_v20 }
 0x199   : >> { %v1017_v18 = vpop.eup %1016 }
 0x19a   : >> { %888 = vmatmul.mubr.msk.f32.vlgmr.msra.gmra.mrb[0].mxu1 %vm393_vm2, %v1017_v18  ;;  %v405_v19 = vsel %vm393_vm2, %v1017_v18, 0.0  ;;  %v1019_v21 = vpop.eup %1018 }
 0x19b   : >> { %406 = vadd.xlane.f32.xlu0 %v405_v19  ;;  %v404_v22 = vmul.f32 %v1116_v5, %v1019_v21  ;;  %v409_v25 = vmul.f32 %v1112_v4, %v1019_v21 }
 0x228   : >> { %v407_v23 = vpop.xlane.xlu0 %406 }
 0x229   : >> { %v408_v24 = vadd.f32 %v407_v23, %v404_v22  }
 0x22b   : >> { %v1115_v5 = vmov %v408_v24   ;;  %v1297_v2 = vmov (%p304_p10), %v408_v24 }
 0x26a   : > { %307 = sbr.rel (!%p304_p10) target bundleno = 32 (0x20), region = 79 }
 0x26d   : >> { %v479_v26 = vpop.f32.mrb[0].mxu1 }
 0x26e   : >> { %v483_v27 = vadd.f32 %v479_v26, %v409_v25   ;;  %v889_v28 = vpop.f32.mrb[1].mxu1 }
 0x270   : >> { %v1111_v4 = vmov %v483_v27   ;;  %v1296_v1 = vmov (%p304_p10), %v483_v27 }
 0x271 PF: > { %s866_s27 = sshll.u32 %s1084_s12, 3  ;;  %vm489_vm3 = vcmask 130048   ;;  %v1140_v29 = vmov 0.0   ;;  %vm1141_vm4 = vmmov 0   ;;  %v566_v31 = vlaneseq  ;;  %v1136_v3 = vphi %v1233_v3, %v1298_v3   ;;  %v1132_v2 = vphi %v1231_v2, %v1297_v2   ;;  %v1128_v1 = vphi %v1229_v1, %v1296_v1  }
 0x272   : > { %890 = vmatprep.subr.mxu0 %v1140_v29  ;;  %s485_s28 = scalar_lea.vmem %s1211_s5, %s866_s27  ;;  %892 = vmatprep.mubr.msk.f32.mxu0 %vm1141_vm4, %v1140_v29  ;;  %vm572_vm6 = vcmask 64512   ;;  %s487_s12 = scalar_lea.vmem %s1219_s11, %s866_s27 }
 0x273   : > { %v486_v30 = vld [vmem:[%s485_s28] sm:$0xff]  ;;  %895 = vmatprep.subr.mxu1 %v1140_v29  ;;  %897 = vmatprep.mubr.msk.f32.mxu1 %vm1141_vm4, %v1140_v29  ;;  %v567_v32 = vshrl.u32 %v566_v31, 7  ;;  %v569_v33 = vand.u32 127, %v566_v31 }
 0x274   : > { %891 = vmatpush3.xpose.msk.msra.mxu0 %vm489_vm3, %v486_v30  ;;  %v488_v38 = vld [vmem:[%s487_s12] sm:$0xff] }
 0x275   : > { %vm570_vm5 = vcmp.le.s32.totalorder %v569_v33, %v567_v32  ;;  %896 = vmatpush3.msra.mxu1 %v488_v38 }
 0x277   : > { %893 = vmatmul.mubr.msk.f32.vlgmr.msra.gmra.mrb[0].mxu0 %vm489_vm3, %v1226_v0 }
 0x34a   : > { %v562_v34 = vpop.f32.mrb[0].mxu0 }
 0x34b   : > { %v571_v35 = vsel %vm570_vm5, %v562_v34, -1e+30  ;;  %v894_v36 = vpop.f32.mrb[1].mxu0 }
 0x34c   : > { %v573_v37 = vsel %vm572_vm6, %v571_v35, -inf }
 0x34d   : > { %574 = vmax.xlane.f32.xlu0 %v573_v37 }
 0x3da   : > { %v575_v39 = vpop.xlane.xlu0 %574 }
 0x3db   : > { %v576_v40 = vmax.f32 %v1136_v3, %v575_v39 }
 0x3dd   : > { %v580_v41 = vsub.f32 %v571_v35, %v576_v40  ;;  %v577_v45 = vsub.f32 %v1136_v3, %v576_v40 }
 0x3df   : > { %v581_v42 = vmul.f32 1.442695, %v580_v41  ;;  %v578_v46 = vmul.f32 1.442695, %v577_v45 }
 0x3e1   : > { %1020 = vpow2.f32 %v581_v42 }
 0x3e2   : > { %1022 = vpow2.f32 %v578_v46 }
 0x3eb   : > { %v1021_v43 = vpop.eup %1020 }
 0x3ec   : > { %898 = vmatmul.mubr.msk.f32.vlgmr.msra.gmra.mrb[0].mxu1 %vm572_vm6, %v1021_v43  ;;  %v584_v44 = vsel %vm572_vm6, %v1021_v43, 0.0  ;;  %v1023_v47 = vpop.eup %1022 }
 0x3ed   : > { %585 = vadd.xlane.f32.xlu0 %v584_v44  ;;  %v583_v49 = vmul.f32 %v1132_v2, %v1023_v47  ;;  %v588_v51 = vmul.f32 %v1128_v1, %v1023_v47 }
 0x47a   : > { %v586_v48 = vpop.xlane.xlu0 %585 }
 0x47b   : > { %v587_v50 = vadd.f32 %v586_v48, %v583_v49 }
 0x47d   : > { %1024 = vrcp.f32 %v587_v50 }
 0x487   : > { %v1025_v55 = vpop.eup %1024 }
 0x4bf   : > { %v658_v52 = vpop.f32.mrb[0].mxu1 }
 0x4c0   : > { %v662_v53 = vadd.f32 %v658_v52, %v588_v51  ;;  %v899_v54 = vpop.f32.mrb[1].mxu1 }
 0x4c2   : > { %v664_v56 = vmul.f32 %v1025_v55, %v662_v53 }
 0x4c4   : > { %665 = vst.msk [vmem:[%s1224_s22] sm:$0xff] %vm489_vm3, %v664_v56 }
 0x4c5 PF: > { %s13_s18 = sadd.s32 1, %s1108_s18   ;;  %s1299_s12 = smov %s1096_s15 }
 0x4c6   : > { %p10_p11 = scmp.ge.s32.totalorder %s13_s18, 18   ;;  %s1300_s13 = smov %s1100_s16 }
 0x4c7   : > { %s1301_s14 = smov %s1104_s17  ;;  %s1302_s15 = smov %s1306_s19 }
 0x4c8   : > { %s1303_s16 = smov %s1310_s20  ;;  %s1304_s17 = smov %s1314_s21 }
 0x4c9   :  { %12 = sbr.rel (!%p10_p11) target bundleno = 4 (0x4), region = 90 }

// kernel: fused_norm_attention_norm.3
= control target key start
LH: loop header
LB: loop body
LE: loop exit
PB: predicated region body
PF: predicated region fallthrough
CT: control target
= control target key end

     0   :  { %s1045_s24 = smov 0   ;;  %s1047_s25 = smov 0   ;;  %s1180_s0 = inlined_call_operand.vmem [shape: f32[2,16,64], index: 0, kind: input, shape index: {}]   ;;  %s1181_s1 = inlined_call_operand.vmem [shape: f32[1,64], index: 1, kind: input, shape index: {}]   ;;  %s1182_s2 = inlined_call_operand.vmem [shape: f32[1,64], index: 2, kind: input, shape index: {}]   ;;  %s1183_s3 = inlined_call_operand.vmem [shape: f32[4,64,48], index: 3, kind: input, shape index: {}]   ;;  %s1184_s4 = inlined_call_operand.vmem [shape: f32[4,1,48], index: 4, kind: input, shape index: {}]   ;;  %s1185_s5 = inlined_call_operand.vmem [shape: f32[2,4,16,16], index: 5, kind: output, shape index: {0}]   ;;  %s1186_s6 = inlined_call_operand.vmem [shape: f32[2,4,16,16], index: 6, kind: output, shape index: {1}]   ;;  %s1187_s7 = inlined_call_operand.vmem [shape: f32[2,4,16,16], index: 7, kind: output, shape index: {2}]  }
   0x1   :  { %1188 = sst [smem:[#allocation6_spill]] %s1180_s0  ;;  %s1049_s26 = smov 0  }
   0x2   :  { %s1051_s27 = smov 0   ;;  %s1053_s28 = smov 0  }
   0x3   :  { %s1055_s29 = smov 0   ;;  %s1057_s30 = smov 0  }
   0x4 LB: > { %s30_s8 = sadd.s32 1, %s986_s27  ;;  %s33_s9 = sadd.s32 1, %s990_s28  ;;  %s998_s30 = sphi %s1057_s30, %s18_s30   ;;  %s994_s29 = sphi %s1055_s29, %s1202_s29   ;;  %s990_s28 = sphi %s1053_s28, %s1201_s28   ;;  %s986_s27 = sphi %s1051_s27, %s1200_s27   ;;  %s982_s26 = sphi %s1049_s26, %s1199_s26   ;;  %s978_s25 = sphi %s1047_s25, %s1198_s25   ;;  %s974_s24 = sphi %s1045_s24, %s1197_s24  }
   0x5   : > { %p31_p0 = scmp.ge.s32.totalorder %s30_s8, 4  ;;  %p819_p1 = scmp.ge.s32.totalorder %s998_s30, 1 }
   0x6   : > { %p296_p2 = scmp.lt.s32.totalorder %s998_s30, 17  ;;  %s37_s10 = sadd.s32 1, %s994_s29 }
   0x7   : > { %s1204_s8 = smov (%p31_p0, %s30_s8), 0  ;;  %s1206_s9 = smov (!%p31_p0, %s33_s9), %s990_s28 }
   0x8   : > { %1189 = sst [smem:[#allocation3_spill]] %s1204_s8  ;;  %p297_p3 = pnand %p819_p1, %p296_p2 }
   0x9   : > { %p35_p4 = scmp.ge.s32.totalorder %s1206_s9, 2  ;;  %p370_p6 = scmp.lt.s32.totalorder (!%p297_p3), %s982_s26, 1 }
   0xa   : > { %300 = sbr.rel (%p297_p3) target bundleno = 690 (0x2b2), region = 40  ;;  %p372_p7 = scmp.lt.s32.totalorder (!%p297_p3), %s978_s25, 1 }
   0xb   : > { %s1208_s9 = smov (%p35_p4, %s1206_s9), 0  ;;  %s1210_s10 = smov (!%p35_p4, %s37_s10), %s994_s29 }
   0xc   : > { %1190 = sst [smem:[#allocation4_spill]] %s1208_s9  ;;  %p39_p5 = scmp.ge.s32.totalorder %s1210_s10, 2 }
   0xd   : > { %p378_p8 = scmp.lt.s32.totalorder (!%p297_p3), %s974_s24, 3  ;;  %s1192_s0 = sld [smem:[#allocation6_spill]] (!%p297_p3) }
   0xe   : > { %s1212_s10 = smov (%p39_p5, %s1210_s10), 0  ;;  %p833_p9 = scmp.ne.s32.totalorder (!%p297_p3), %s974_s24, 0 }
   0xf   : > { %1191 = sst [smem:[#allocation5_spill]] %s1212_s10 }
  0x11   : > { %s1214_s26 = smov (!%p370_p6, %s982_s26), 1  ;;  %s1216_s25 = smov (!%p372_p7, %s978_s25), 1 }
  0x12   : > { %s820_s11 = sshll.u32 %s1214_s26, 1  ;;  %s825_s18 = sshll.u32 %s1214_s26, 3  ;;  %vm429_vm0 = vcmask (!%p833_p9), 523264   ;;  %v834_v11 = vld [vmem:[%s1181_s1] ss:$0 sm:$0xff] (!%p833_p9) }
  0x13   : > { %s375_s12 = sadd.s32 %s820_s11, %s1216_s25  ;;  %v835_v13 = vld [vmem:[%s1182_s2] ss:$0 sm:$0xff] (!%p833_p9) }
  0x14   : > { %s821_s13 = sshll.u32 %s375_s12, 3 }
  0x15   : > { %s377_s16 = scalar_lea.vmem %s1192_s0, %s821_s13 }
  0x16   : > { %s1094_s17 = scalar_select %p378_p8, %s974_s24, 3 }
  0x17   : > { %425 = sbr.rel (%p833_p9) target bundleno = 338 (0x152), region = 44  ;;  %v426_v0 = vld [vmem:[%s377_s16] sm:$0xff] (!%p833_p9) }
  0x18   : > { %s840_s19 = sshll.u32 %s1094_s17, 6  ;;  %s824_s12 = sshll.u32 %s1094_s17, 1  ;;  %v430_v1 = vsel (!%p833_p9), %vm429_vm0, %v426_v0, 0.0 }
  0x19   : > { %s1104_s11 = scalar_lea.vmem %s1183_s3, %s840_s19  ;;  %s393_s9 = sadd.s32 %s824_s12, %s1216_s25  ;;  %431 = vadd.xlane.f32.xlu0 (!%p833_p9), %v430_v1 }
  0x1a   : > { %s395_s14 = sadd.s32 %s825_s18, %s393_s9 }
  0x1b   : > { %s1107_s13 = sshll.u32 %s395_s14, 3 }
  0x1c   : > { %s397_s26 = scalar_lea.vmem %s1185_s5, %s1107_s13  ;;  %s409_s21 = scalar_lea.vmem %s1186_s6, %s1107_s13 }
  0x1d   : > { %s421_s19 = scalar_lea.vmem %s1187_s7, %s1107_s13 }
  0xa6   : > { %v432_v2 = vpop.xlane.xlu0 %431 }
  0xa7   : > { %v434_v3 = vmul.f32 0.015625, %v432_v2 }
  0xa9   : > { %v435_v4 = vsub.f32 %v426_v0, %v434_v3 }
  0xab   : > { %v436_v5 = vmul.f32 %v435_v4, %v435_v4 }
  0xad   : > { %v437_v6 = vsel %vm429_vm0, %v436_v5, 0.0 }
  0xae   : > { %438 = vadd.xlane.f32.xlu0 %v437_v6 }
 0x13b   : > { %v439_v7 = vpop.xlane.xlu0 %438 }
 0x13c   : > { %v440_v8 = vmul.f32 0.015625, %v439_v7 }
 0x13e   : > { %v441_v9 = vadd.f32 1e-05, %v440_v8 }
 0x140   : > { %942 = vrsqrt.f32 %v441_v9 }
 0x14a   : > { %v943_v10 = vpop.eup %942 }
 0x14b   : > { %v443_v12 = vmul.f32 %v943_v10, %v435_v4 }
 0x14d   : > { %v450_v14 = vmul.f32 %v834_v11, %v443_v12 }
 0x14f   : > { %v457_v15 = vadd.f32 %v835_v13, %v450_v14 }
 0x151   : > { %458 = vst.msk [vmem:[#allocation2] sm:$0xff] %vm429_vm0, %v457_v15 }
 0x152 PF: > { %v460_v16 = vld [vmem:[%s1104_s11] sm:$0xff]  ;;  %v461_v17 = vld [vmem:[%s1104_s11 + $0x8] sm:$0xff]  ;;  %v462_v18 = vld [vmem:[%s1104_s11 + $0x10] sm:$0xff]  ;;  %v1000_v19 = vmov 0.0|0.0   ;;  %vm1001_vm1 = vmmov 0   ;;  %v1002_v22 = vmov 0.0   ;;  %s1193_s18 = scalar_lea.vmem %s1184_s4, %s1094_s17 }
 0x153   : > { %869 = vmatprep.subr.bf16.mxu0 %v1000_v19  ;;  %v870_v20 = vpack.c.bf16 %v461_v17, %v460_v16  ;;  %v463_v21 = vld [vmem:[%s1104_s11 + $0x18] sm:$0xff]  ;;  %866 = vmatprep.mubr.msk.f32.mxu0 %vm1001_vm1, %v1002_v22  ;;  %v464_v24 = vld [vmem:[%s1104_s11 + $0x20] sm:$0xff]  ;;  %v465_v25 = vld [vmem:[%s1104_s11 + $0x28] sm:$0xff]  ;;  %vm475_vm2 = vcmask 523264   ;;  %vm549_vm3 = vcmask 130048   ;;  %s1003_s22 = smov 112  }
 0x154   : > { %v873_v23 = vpack.c.bf16 %v463_v21, %v462_v18  ;;  %v876_v26 = vpack.c.bf16 %v465_v25, %v464_v24  ;;  %v466_v27 = vld [vmem:[%s1104_s11 + $0x30] sm:$0xff]  ;;  %v467_v28 = vld [vmem:[%s1104_s11 + $0x38] sm:$0xff]  ;;  %v836_v31 = vld [vmem:[%s1193_s18] ss:$0 sm:$0xff]  ;;  %s1004_s12 = smov 96  }
 0x155   : > { %871 = vmatpush3.bf16.msra.mxu0 %v870_v20  ;;  %v879_v29 = vpack.c.bf16 %v467_v28, %v466_v27 }
 0x156   : > { %872 = vmatprep.subr.bf16.mxu0 %v1000_v19 }
 0x158   : > { %v459_v30 = vld [vmem:[#allocation2] sm:$0xff] }
 0x159   : > { %874 = vmatpush3.bf16.msra.mxu0 %v873_v23 }
 0x15a   : > { %875 = vmatprep.subr.bf16.mxu0 %v1000_v19 }
 0x15d   : > { %877 = vmatpush3.bf16.msra.mxu0 %v876_v26 }
 0x15e   : > { %878 = vmatprep.subr.bf16.mxu0 %v1000_v19 }
 0x161   : > { %880 = vmatpush3.bf16.msra.mxu0 %v879_v29 }
 0x164   : > { %867 = vmatmul.mubr.msk.f32.vlgmr.msra.gmra.mrb[0].mxu0 %vm475_vm2, %v459_v30 }
 0x237   : > { %v545_v32 = vpop.f32.mrb[0].mxu0 }
 0x238   : > { %v546_v33 = vadd.f32 %v836_v31, %v545_v32  ;;  %v868_v34 = vpop.f32.mrb[1].mxu0 }
 0x23a   : > { %552 = vrot.lane.b32.xlu0 %v546_v33, %s1003_s22  ;;  %550 = vst.msk [vmem:[%s397_s26] sm:$0xff] %vm549_vm3, %v546_v33 }
 0x23e   : > { %556 = vrot.lane.b32.xlu0 %v546_v33, %s1004_s12 }
 0x2ac   : > { %v553_v35 = vpop.permute.xlu0 %552 }
 0x2ad   : > { %555 = vst.msk [vmem:[%s409_s21] sm:$0xff] %vm549_vm3, %v553_v35 }
 0x2b0   : > { %v557_v36 = vpop.permute.xlu0 %556 }
 0x2b1   : > { %559 = vst.msk [vmem:[%s421_s19] sm:$0xff] %vm549_vm3, %v557_v36 }
 0x2b2 PF: > { %s18_s30 = sadd.s32 1, %s998_s30   ;;  %s1194_s10 = sld [smem:[#allocation3_spill]] }
 0x2b3   : > { %p15_p10 = scmp.ge.s32.totalorder %s18_s30, 18   ;;  %s1195_s0 = sld [smem:[#allocation4_spill]] }
 0x2b4   : > { %s1196_s8 = sld [smem:[#allocation5_spill]]  ;;  %s1197_s24 = smov %s986_s27 }
 0x2b5   : > { %s1198_s25 = smov %s990_s28  ;;  %s1199_s26 = smov %s994_s29 }
 0x2b6   :  { %17 = sbr.rel (!%p15_p10) target bundleno = 4 (0x4), region = 104 }
 0x2b8   : > { %s1200_s27 = smov %s1194_s10 }
 0x2b9   : > { %s1201_s28 = smov %s1195_s0 }
 0x2ba   : > { %s1202_s29 = smov %s1196_s8 }

// kernel: fused_norm_attention_norm.5
= control target key start
LH: loop header
LB: loop body
LE: loop exit
PB: predicated region body
PF: predicated region fallthrough
CT: control target
= control target key end

     0   :  { %s1367_s0 = inlined_call_operand.vmem [shape: f32[2,16,64], index: 0, kind: input, shape index: {}]   ;;  %s1368_s1 = inlined_call_operand.hbm [shape: f32[2,16,64], index: 1, kind: input, shape index: {}, may-alias: {1,6}]   ;;  %s1369_s2 = inlined_call_operand.vmem [shape: f32[64,64], index: 2, kind: input, shape index: {}]   ;;  %s1370_s3 = inlined_call_operand.vmem [shape: f32[1,64], index: 3, kind: input, shape index: {}]   ;;  %s1371_s4 = inlined_call_operand.vmem [shape: f32[1,64], index: 4, kind: input, shape index: {}]   ;;  %s1372_s5 = inlined_call_operand.vmem [shape: f32[1,64], index: 5, kind: input, shape index: {}]   ;;  %s1373_s6 = inlined_call_operand.hbm [shape: f32[2,16,64], index: 6, kind: output, shape index: {0}, may-alias: {1,6}]   ;;  %s1374_s7 = inlined_call_operand.hbm [shape: f32[2,16,64], index: 7, kind: output, shape index: {1}]  }
   0x1   :  { %1381 = sst [smem:[#allocation15_spill]] %s1374_s7 }
   0x2   :  { %13 = vsyncpa [#allocation4], 0 }
   0x3   :  { %15 = vsyncpa [#allocation4 + $0x1], 0 }
   0x4   :  { %16 = vsyncpa [#allocation5], 0 }
   0x5   :  { %18 = vsyncpa [#allocation5 + $0x1], 0 }
   0x6   :  { %19 = vsyncpa [#allocation8], 0 }
   0x7   :  { %21 = vsyncpa [#allocation8 + $0x1], 0  ;;  %s1090_s24 = smov 0   ;;  %s1092_s25 = smov 0  }
   0x8   :  { %s1094_s26 = smov 0   ;;  %s1096_s27 = smov 0  }
   0x9   :  { %s1098_s28 = smov 0   ;;  %s1100_s29 = smov 0  }
   0xa   :  { %s1102_s30 = smov 0   ;;  %s1104_s8 = smov 0  }
   0xb LB: > { %1382 = sst [smem:[#allocation12_spill]] %s1014_s24  ;;  %s728_s9 = sadd.s32 4294967295, %s1042_s8   ;;  %s1042_s8 = sphi %s1104_s8, %s27_s8   ;;  %s1038_s30 = sphi %s1102_s30, %s1406_s30   ;;  %s1034_s29 = sphi %s1100_s29, %s1405_s29   ;;  %s1030_s28 = sphi %s1098_s28, %s1404_s28   ;;  %s1026_s27 = sphi %s1096_s27, %s1403_s27   ;;  %s1022_s26 = sphi %s1094_s26, %s1402_s26   ;;  %s1018_s25 = sphi %s1092_s25, %s1401_s25   ;;  %s1014_s24 = sphi %s1090_s24, %s1400_s24  }
   0xc   : > { %s729_s10 = sadd.s32 4294967294, %s1042_s8   ;;  %s42_s11 = sadd.s32 1, %s1034_s29 }
   0xd   : > { %s46_s12 = sadd.s32 1, %s1038_s30  ;;  %p44_p0 = scmp.ge.s32.totalorder %s42_s11, 2 }
   0xe   : > { %s85_s13 = sadd.s32 1, %s1022_s26  ;;  %p92_p1 = scmp.ne.s32.totalorder %s1022_s26, %s1018_s25 }
   0xf   : > { %p93_p2 = scmp.eq.s32.totalorder %s1042_s8, 0  ;;  %s1408_s11 = smov (%p44_p0, %s42_s11), 0 }
  0x10   : > { %1383 = sst [smem:[#allocation13_spill]] %s1408_s11  ;;  %s1410_s12 = smov (!%p44_p0, %s46_s12), %s1038_s30 }
  0x11   : > { %s81_s14 = ssub.s32 %s1034_s29, %s1408_s11  ;;  %p1143_p3 = por %p93_p2, %p92_p1 }
  0x12   : > { %p48_p4 = scmp.ge.s32.totalorder %s1410_s12, 2  ;;  %p98_p5 = scmp.ne.s32.totalorder %s1018_s25, %s1014_s24 }
  0x13   : > { %p99_p6 = scmp.eq.s32.totalorder %s728_s9, 0  ;;  %p213_p7 = scmp.eq.s32.totalorder %s728_s9, 3 }
  0x14   : > { %s1412_s12 = smov (%p48_p4, %s1410_s12), 0  ;;  %p219_p10 = scmp.eq.s32.totalorder %s729_s10, 3 }
  0x15   : > { %1385 = sst [smem:[#allocation14_spill]] %s1412_s12  ;;  %p1151_p8 = por %p99_p6, %p98_p5 }
  0x16   : > { %p1155_p9 = por %p213_p7, %p92_p1  ;;  %s80_s18 = ssub.s32 %s1038_s30, %s1412_s12 }
  0x17   : > { %s82_s19 = sor.u32 %s81_s14, %s80_s18  ;;  %p1161_p12 = por %p219_p10, %p98_p5 }
  0x18   : > { %s1387_s17 = scalar_select %p1155_p9, 1, 0 }
  0x19   : > { %p83_p11 = scmp.eq.s32.totalorder %s82_s19, 0  ;;  %p811_p13 = scmp.lt.s32.totalorder %s1042_s8, 4 }
  0x1a   : > { %s1388_s20 = scalar_select %p1161_p12, 1, 0 }
  0x1b   : > { %s299_s21 = sand.u32 1, %s1022_s26   ;;  %s734_s9 = sshll.u32 %s1038_s30, 1 }
  0x1c   : > { %s1168_s22 = scalar_select %p83_p11, %s1022_s26, %s85_s13  }
  0x1d   : > { %s733_s23 = sshll.u32 %s299_s21, 3  ;;  %s308_s11 = sadd.s32 %s1034_s29, %s734_s9 }
  0x1e   : > { %s303_s24 = scalar_lea.vmem [#allocation3], %s733_s23  ;;  %s735_s12 = sshll.u32 %s308_s11, 7 }
  0x1f   : > { %s312_s7 = sshll.u32 %s303_s24, 4  ;;  %s1177_s18 = scalar_lea.hbm %s1368_s1, %s735_s12  ;;  %s1172_s7 = int_to_ptr.vmem [resolvable:$true] %s312_s7 }
  0x20   : > { %p1181_p0 = pnand %p811_p13, %p1143_p3  ;;  %s300_s24 = scalar_lea.sflag [#allocation4], %s299_s21 }
  0x21   : > { %s882_s11 = scalar_lea.hbm %s1177_s18, 128  ;;  %s887_s19 = scalar_lea.hbm %s1368_s1, 512 }
  0x22   : > { %p883_p4 = scmp.ne.s32.totalorder %s1177_s18, %s882_s11  ;;  %p884_p5 = pneg %p1181_p0 }
  0x23   : > { %p888_p3 = scmp.lt.u32.totalorder %s1177_s18, %s1368_s1  ;;  %p889_p10 = scmp.lt.u32.totalorder %s887_s19, %s882_s11 }
  0x24   : > { %p885_p6 = pnand %p884_p5, %p883_p4  ;;  %p891_p13 = scmp.lt.u32.totalorder %s882_s11, %s1177_s18 }
  0x25   : > { %p890_p11 = por %p889_p10, %p888_p3 }
  0x26   : > { %p886_p7 = pneg %p885_p6 }
  0x27   : > { %p892_p1 = por %p891_p13, %p890_p11 }
  0x29   : > { %p893_p2 = pnand %p892_p1, %p886_p7 }
  0x2b   : > { %896 = shalt.err (!%p893_p2)
}
  0x2c   : > { %s897_s21 = scalar_lea.vmem %s1172_s7, 128  ;;  %s1044_s10 = smov [#allocation3]  }
  0x2d   : > { %p898_p4 = scmp.ne.s32.totalorder %s1172_s7, %s897_s21  ;;  %s902_s14 = sshll.u32 %s1044_s10, 4  ;;  %s903_s14 = int_to_ptr.vmem [resolvable:$false] %s902_s14 }
  0x2e   : > { %s904_s12 = scalar_lea.vmem %s903_s14, 256  ;;  %p905_p9 = scmp.lt.s32.totalorder %s1172_s7, %s903_s14 }
  0x2f   : > { %p900_p6 = pnand %p898_p4, %p884_p5  ;;  %p906_p3 = scmp.lt.s32.totalorder %s904_s12, %s897_s21 }
  0x31   : > { %p901_p12 = pneg %p900_p6  ;;  %p907_p10 = por %p906_p3, %p905_p9 }
  0x33   : > { %p908_p11 = pnand %p907_p10, %p901_p12 }
  0x35   : > { %911 = shalt.err (!%p908_p11)
}
  0x36   : > { %803 = dma.hbm_to_vmem [thread:$0]  (!%p1181_p0), %s1177_s18, 128, %s1172_s7, %s300_s24  }
  0x37   : > { %p1390_p1 = scmp.lt.s32.totalorder %s1042_s8, 5  ;;  %p1391_p2 = scmp.ge.s32.totalorder %s1042_s8, 1 }
  0x39   : > { %p318_p5 = pnand %p1391_p2, %p1390_p1 }
  0x3a   : > { %s1217_s11 = sand.u32 (!%p318_p5), 1, %s1018_s25  }
  0x3b   : > { %321 = sbr.rel (%p318_p5) target bundleno = 639 (0x27f), region = 44  ;;  %s1220_s15 = sshll.u32 (!%p318_p5), %s1217_s11, 3 }
  0x3c   : > { %s324_s19 = scalar_lea.sflag (!%p318_p5), [#allocation4], %s1217_s11 }
  0x42   : > { %1001 = dma.done.wait (%p1151_p8), %s324_s19, 128  }
  0x43   : > { %1003 = vsyncadd (%p1151_p8), %s324_s19, 4294967168  ;;  %vm400_vm0 = vcmask 523264   ;;  %v1045_v0 = vmov 0.0|0.0   ;;  %v1046_v1 = vmov 0.0   ;;  %vm1047_vm1 = vmmov 0   ;;  %p379_p9 = scmp.lt.s32.totalorder %s1030_s28, 1 }
  0x44   : > { %782 = vmatprep.subr.bf16.mxu0 %v1045_v0  ;;  %401 = vst.msk [vmem:[#allocation2] sm:$0xff] %vm400_vm0, %v1046_v1  ;;  %779 = vmatprep.mubr.msk.f32.mxu0 %vm1047_vm1, %v1046_v1  ;;  %p381_p12 = scmp.lt.s32.totalorder %s1026_s27, 1  ;;  %v404_v2 = vld [vmem:[%s1369_s2] sm:$0xff]  ;;  %v405_v3 = vld [vmem:[%s1369_s2 + $0x8] sm:$0xff]  ;;  %v406_v4 = vld [vmem:[%s1369_s2 + $0x10] sm:$0xff]  ;;  %p1393_p0 = scmp.ne.s32.totalorder %s1387_s17, 0 }
  0x45   : > { %s380_s7 = scalar_select %p379_p9, %s1030_s28, 1  ;;  %v783_v5 = vpack.c.bf16 %v405_v3, %v404_v2  ;;  %v407_v6 = vld [vmem:[%s1369_s2 + $0x18] sm:$0xff]  ;;  %v408_v8 = vld [vmem:[%s1369_s2 + $0x20] sm:$0xff]  ;;  %v409_v9 = vld [vmem:[%s1369_s2 + $0x28] sm:$0xff] }
  0x46   : > { %s382_s12 = scalar_select %p381_p12, %s1026_s27, 1  ;;  %v786_v7 = vpack.c.bf16 %v407_v6, %v406_v4  ;;  %v789_v10 = vpack.c.bf16 %v409_v9, %v408_v8  ;;  %v410_v11 = vld [vmem:[%s1369_s2 + $0x30] sm:$0xff]  ;;  %v411_v12 = vld [vmem:[%s1369_s2 + $0x38] sm:$0xff]  ;;  %v743_v21 = vld [vmem:[%s1370_s3] ss:$0 sm:$0xff] }
  0x47   : > { %784 = vmatpush3.bf16.msra.mxu0 %v783_v5  ;;  %s740_s19 = sshll.u32 %s380_s7, 1  ;;  %v792_v13 = vpack.c.bf16 %v411_v12, %v410_v11 }
  0x48   : > { %785 = vmatprep.subr.bf16.mxu0 %v1045_v0  ;;  %s387_s9 = sadd.s32 %s740_s19, %s382_s12  ;;  %s1392_s19 = scalar_lea.vmem [#allocation3], %s1220_s15 }
  0x49   : > { %s741_s13 = sshll.u32 %s387_s9, 3  ;;  %v491_v19 = vld [vmem:[%s1392_s19] sm:$0xff]  ;;  %s748_s9 = sshll.u32 %s1030_s28, 1 }
  0x4a   : > { %s389_s12 = scalar_lea.vmem %s1367_s0, %s741_s13  ;;  %s371_s13 = scalar_lea.vmem [#allocation6], %s1220_s15 }
  0x4b   : > { %787 = vmatpush3.bf16.msra.mxu0 %v786_v7  ;;  %v403_v14 = vld [vmem:[%s389_s12] sm:$0xff]  ;;  %s1273_s21 = sadd.s32 %s1026_s27, %s748_s9  ;;  %s555_s10 = sshll.u32 %s371_s13, 4  ;;  %s1276_s10 = int_to_ptr.vmem [resolvable:$true] %s555_s10 }
  0x4c   : > { %788 = vmatprep.subr.bf16.mxu0 %v1045_v0  ;;  %v402_v15 = vld [vmem:[#allocation2] sm:$0xff]  ;;  %s1380_s14 = sshll.u32 %s1273_s21, 7  ;;  %s535_s12 = scalar_lea.sflag [#allocation5], %s1217_s11 }
  0x4d   : > { %s553_s24 = scalar_lea.hbm %s1373_s6, %s1380_s14  ;;  %s912_s19 = scalar_lea.vmem %s1276_s10, 128 }
  0x4e   : > { %p913_p8 = scmp.ne.s32.totalorder %s1276_s10, %s912_s19  ;;  %s1048_s27 = smov [#allocation6]  }
  0x4f   : > { %790 = vmatpush3.bf16.msra.mxu0 %v789_v10  ;;  %s916_s28 = sshll.u32 %s1048_s27, 4  ;;  %s917_s28 = int_to_ptr.vmem [resolvable:$false] %s916_s28 }
  0x50   : > { %791 = vmatprep.subr.bf16.mxu0 %v1045_v0  ;;  %p914_p7 = pnand %p913_p8, %p1393_p0  ;;  %s918_s16 = scalar_lea.vmem %s917_s28, 256 }
  0x51   : > { %p919_p4 = scmp.lt.s32.totalorder %s1276_s10, %s917_s28  ;;  %p920_p6 = scmp.lt.s32.totalorder %s918_s16, %s912_s19 }
  0x52   : > { %p915_p13 = pneg %p914_p7 }
  0x53   : > { %793 = vmatpush3.bf16.msra.mxu0 %v792_v13  ;;  %p921_p3 = por %p920_p6, %p919_p4 }
  0x55   : > { %p922_p10 = pnand %p921_p3, %p915_p13 }
  0x56   : > { %780 = vmatmul.mubr.msk.f32.vlgmr.msra.gmra.mrb[0].mxu0 %vm400_vm0, %v403_v14 }
 0x129   : > { %v482_v16 = vpop.f32.mrb[0].mxu0 }
 0x12a   : > { %v486_v17 = vadd.f32 %v482_v16, %v402_v15  ;;  %v781_v18 = vpop.f32.mrb[1].mxu0 }
 0x12c   : > { %487 = vst.msk [vmem:[#allocation2] sm:$0xff] %vm400_vm0, %v486_v17 }
 0x133   : > { %v492_v20 = vld [vmem:[#allocation2] sm:$0xff] }
 0x134   : > { %v493_v22 = vadd.f32 %v492_v20, %v491_v19 }
 0x136   : > { %v501_v23 = vadd.f32 %v743_v21, %v493_v22 }
 0x138   : > { %v505_v24 = vsel %vm400_vm0, %v501_v23, 0.0  ;;  %502 = vst.msk [vmem:[%s371_s13] sm:$0xff] %vm400_vm0, %v501_v23 }
 0x139   : > { %506 = vadd.xlane.f32.xlu0 %v505_v24 }
 0x1c6   : > { %v507_v25 = vpop.xlane.xlu0 %506 }
 0x1c7   : > { %v509_v26 = vmul.f32 0.015625, %v507_v25 }
 0x1c9   : > { %v510_v27 = vsub.f32 %v501_v23, %v509_v26 }
 0x1cb   : > { %v511_v28 = vmul.f32 %v510_v27, %v510_v27 }
 0x1cd   : > { %v512_v29 = vsel %vm400_vm0, %v511_v28, 0.0 }
 0x1ce   : > { %513 = vadd.xlane.f32.xlu0 %v512_v29 }
 0x1cf   : > { %925 = shalt.err (!%p922_p10)
}
 0x1d0   : > { %s926_s23 = scalar_lea.hbm %s553_s24, 128  ;;  %s930_s7 = scalar_lea.hbm %s1373_s6, 512 }
 0x1d1   : > { %p927_p11 = scmp.ne.s32.totalorder %s553_s24, %s926_s23  ;;  %p931_p5 = scmp.lt.u32.totalorder %s553_s24, %s1373_s6 }
 0x1d2   : > { %p932_p9 = scmp.lt.u32.totalorder %s930_s7, %s926_s23  ;;  %p934_p8 = scmp.lt.u32.totalorder %s926_s23, %s553_s24 }
 0x1d3   : > { %p928_p1 = pnand %p927_p11, %p1393_p0 }
 0x1d4   : > { %p933_p12 = por %p932_p9, %p931_p5 }
 0x1d5   : > { %p929_p2 = pneg %p928_p1 }
 0x1d6   : > { %p935_p7 = por %p934_p8, %p933_p12 }
 0x1d8   : > { %p936_p13 = pnand %p935_p7, %p929_p2 }
 0x1da   : > { %939 = shalt.err (!%p936_p13)
}
 0x1db   : > { %796 = dma.vmem_to_hbm [thread:$0]  (%p1393_p0), %s1276_s10, 128, %s553_s24, %s535_s12   ;;  %v744_v34 = vld [vmem:[%s1371_s4] ss:$0 sm:$0xff] }
 0x1dc   : > { %v745_v36 = vld [vmem:[%s1372_s5] ss:$0 sm:$0xff]  ;;  %s378_s16 = scalar_lea.vmem [#allocation7], %s1220_s15  ;;  %s1394_s10 = sshll.u32 %s1273_s21, 7 }
 0x1dd   : > { %s570_s23 = sshll.u32 %s378_s16, 4  ;;  %s1395_s13 = sld [smem:[#allocation15_spill]]  ;;  %s1314_s23 = int_to_ptr.vmem [resolvable:$true] %s570_s23 }
 0x1de   : > { %s540_s7 = scalar_lea.sflag [#allocation8], %s1217_s11  ;;  %s940_s18 = scalar_lea.vmem %s1314_s23, 128 }
 0x1df   : > { %p941_p4 = scmp.ne.s32.totalorder %s1314_s23, %s940_s18  ;;  %s1049_s15 = smov [#allocation7]  }
 0x1e0   : > { %s944_s21 = sshll.u32 %s1049_s15, 4  ;;  %s945_s21 = int_to_ptr.vmem [resolvable:$false] %s944_s21 }
 0x1e1   : > { %p942_p6 = pnand %p941_p4, %p1393_p0  ;;  %s946_s14 = scalar_lea.vmem %s945_s21, 256 }
 0x1e2   : > { %p947_p10 = scmp.lt.s32.totalorder %s1314_s23, %s945_s21  ;;  %p948_p11 = scmp.lt.s32.totalorder %s946_s14, %s940_s18 }
 0x1e3   : > { %s1312_s9 = scalar_lea.hbm %s1395_s13, %s1394_s10  ;;  %p943_p3 = pneg %p942_p6 }
 0x1e4   : > { %p949_p1 = por %p948_p11, %p947_p10 }
 0x1e6   : > { %p950_p2 = pnand %p949_p1, %p943_p3 }
 0x25b   : > { %v514_v30 = vpop.xlane.xlu0 %513 }
 0x25c   : > { %v515_v31 = vmul.f32 0.015625, %v514_v30 }
 0x25e   : > { %v516_v32 = vadd.f32 1e-05, %v515_v31 }
 0x260   : > { %880 = vrsqrt.f32 %v516_v32 }
 0x26a   : > { %v881_v33 = vpop.eup %880 }
 0x26b   : > { %v518_v35 = vmul.f32 %v881_v33, %v510_v27 }
 0x26d   : > { %v525_v37 = vmul.f32 %v744_v34, %v518_v35 }
 0x26f   : > { %v532_v38 = vadd.f32 %v745_v36, %v525_v37 }
 0x271   : > { %533 = vst.msk [vmem:[%s378_s16] sm:$0xff] %vm400_vm0, %v532_v38 }
 0x272   : > { %953 = shalt.err (!%p950_p2)
}
 0x273   : > { %s954_s11 = scalar_lea.hbm %s1312_s9, 128  ;;  %s958_s28 = scalar_lea.hbm %s1395_s13, 512 }
 0x274   : > { %p955_p5 = scmp.ne.s32.totalorder %s1312_s9, %s954_s11  ;;  %p959_p8 = scmp.lt.u32.totalorder %s1312_s9, %s1395_s13 }
 0x275   : > { %p960_p7 = scmp.lt.u32.totalorder %s958_s28, %s954_s11  ;;  %p962_p4 = scmp.lt.u32.totalorder %s954_s11, %s1312_s9 }
 0x276   : > { %p956_p9 = pnand %p955_p5, %p1393_p0 }
 0x277   : > { %p961_p13 = por %p960_p7, %p959_p8 }
 0x278   : > { %p957_p12 = pneg %p956_p9 }
 0x279   : > { %p963_p6 = por %p962_p4, %p961_p13 }
 0x27b   : > { %p964_p3 = pnand %p963_p6, %p957_p12 }
 0x27d   : > { %967 = shalt.err (!%p964_p3)
}
 0x27e   : > { %797 = dma.vmem_to_hbm [thread:$0]  (%p1393_p0), %s1314_s23, 128, %s1312_s9, %s540_s7  }
 0x27f PF: > { %s1396_s24 = sld [smem:[#allocation12_spill]]  ;;  %p812_p10 = scmp.ge.s32.totalorder %s1042_s8, 2 }
 0x280   : > { %p1397_p11 = scmp.ne.s32.totalorder %s1388_s20, 0 }
 0x282   : > { %p805_p1 = pnand %p812_p10, %p1397_p11 }
 0x285   : > { %s582_s12 = sand.u32 1, %s1396_s24  }
 0x286   : > { %s583_s18 = scalar_lea.sflag [#allocation5], %s582_s12 }
 0x287   : > { %1005 = dma.done.wait (!%p805_p1), %s583_s18, 128  }
 0x288   : > { %1007 = vsyncadd (!%p805_p1), %s583_s18, 4294967168  ;;  %s592_s15 = scalar_lea.sflag [#allocation8], %s582_s12 }
 0x289   : > { %1009 = dma.done.wait (!%p805_p1), %s592_s15, 128  }
 0x28a   : > { %1011 = vsyncadd (!%p805_p1), %s592_s15, 4294967168  ;;  %s27_s8 = sadd.s32 1, %s1042_s8   ;;  %s1398_s17 = sld [smem:[#allocation13_spill]] }
 0x28b   : > { %p24_p2 = scmp.ge.s32.totalorder %s27_s8, 6   ;;  %s1399_s23 = sld [smem:[#allocation14_spill]] }
 0x28c   : > { %s1400_s24 = smov %s1018_s25  ;;  %s1401_s25 = smov %s1022_s26 }
 0x28d   : > { %s1402_s26 = smov %s1168_s22  ;;  %s1403_s27 = smov %s1034_s29 }
 0x28e   : > { %s1404_s28 = smov %s1038_s30  ;;  %26 = sbr.rel (!%p24_p2) target bundleno = 11 (0xb), region = 120 }
 0x290   : > { %s1405_s29 = smov %s1398_s17 }
 0x291   : > { %s1406_s30 = smov %s1399_s23 }
 0x295   :  { %597 = vsyncpa [#allocation4], 1 }
 0x296   :  { %599 = vsyncpa [#allocation4 + $0x1], 1 }
 0x297   :  { %600 = vsyncpa [#allocation5], 1 }
 0x298   :  { %602 = vsyncpa [#allocation5 + $0x1], 1 }
 0x299   :  { %603 = vsyncpa [#allocation8], 1 }
 0x29a   :  { %605 = vsyncpa [#allocation8 + $0x1], 1 }

</bundles_post_ra>
